<compile_context>
chip_gen: v5e
topology: v5e:2x2
jax: 0.10.0
libtpu: 0.0.40
codegen_flags: <defaults>
</compile_context>

<pallas_src>
import functools

import jax
import jax.numpy as jnp
from jax.experimental import pallas as pl
from jax.experimental.pallas import tpu as pltpu

LN_EPS = 1e-5  # PyTorch nn.LayerNorm default


def _layernorm(x, gamma, beta):
    mu = jnp.mean(x, axis=-1, keepdims=True)
    var = jnp.mean(jnp.square(x - mu), axis=-1, keepdims=True)
    return (x - mu) * jax.lax.rsqrt(var + LN_EPS) * gamma + beta


def _gelu_exact(x):
    # PyTorch nn.GELU() default is the exact erf-based form.
    return 0.5 * x * (1.0 + jax.lax.erf(x * jnp.float32(0.7071067811865476)))


# ---------------------------------------------------------------------------
# Fused Pallas kernel: one grid step == (batch-per-core) through the whole net
# ---------------------------------------------------------------------------

def fused_gmlp_kernel(p_ref, wpe_ref, bpe_ref,
                      ln1g_ref, ln1b_ref, w1_ref, b1_ref,
                      ln2g_ref, ln2b_ref, wp_ref, bp_ref, w2_ref, b2_ref,
                      avg_ref, wh_ref, bh_ref, o_ref, *, depths, gate_dim):
    # p_ref: (R, K) where R = batches_per_step * num_patches (batch folded
    # into the row/sublane axis so every MXU/VPU op sees full tiles).
    tok = (jnp.dot(p_ref[...], wpe_ref[...],
                   preferred_element_type=jnp.float32) + bpe_ref[...])      # (R, D)

    # gMLP blocks; tokens stay resident in VMEM/vregs across all layers.
    for d in range(depths):  # static unroll (depths is small & compile-time)
        xn = _layernorm(tok, ln1g_ref[d], ln1b_ref[d])                      # (R, D)
        # Single lane-dense (D, CH=128) fc1 matmul; GELU once over the full
        # 128-lane tile; u/v split is a static lane slice (re-merged per the
        # perf review - better MXU/EUP utilization than two 64-column dots).
        h = _gelu_exact(
            jnp.dot(xn, w1_ref[d], preferred_element_type=jnp.float32)
            + b1_ref[d])                                                    # (R, CH)
        u = h[:, :gate_dim]                                                 # (R, G)
        v = h[:, gate_dim:]                                                 # (R, G)
        # SpatialGatingUnit: proj over the sequence axis, per batch element.
        #   torch: proj(norm(v).transpose(-1,-2)).transpose(-1,-2)
        #   => v_out[n, g] = sum_m Wp[n, m] * vn[m, g] + bp[n]
        # wp_ref[d] is block-diagonal over the batch-folded rows, so one dot
        # handles all batch elements of this step without mixing sequences.
        vn = _layernorm(v, ln2g_ref[d], ln2b_ref[d])                        # (R, G)
        v_out = (jnp.dot(wp_ref[d], vn, preferred_element_type=jnp.float32)
                 + bp_ref[d])                                               # (R, G)
        tok = (jnp.dot(u * v_out, w2_ref[d],
                       preferred_element_type=jnp.float32) + b2_ref[d])     # (R, D)
        # TODO(synk): nn.Dropout(drop) with drop=0 is identity; omitted here.

    # Head: per-batch mean over the sequence via one (BS, R) averaging matmul
    # (keeps the data lane-dense), final linear, one (BS, NC) store per step.
    pooled = jnp.dot(avg_ref[...], tok, preferred_element_type=jnp.float32)  # (BS, D)
    o_ref[...] = (jnp.dot(pooled, wh_ref[...],
                          preferred_element_type=jnp.float32) + bh_ref[...])


# ---------------------------------------------------------------------------
# Wrapper
# ---------------------------------------------------------------------------

def _full_spec(a):
    n = a.ndim
    return pl.BlockSpec(a.shape, lambda s, _n=n: (0,) * _n)


def extract_patches(x, patch):
    # NCHW -> [B, N, C*P*P] with flatten order (C, P, P) matching Conv2d weight.
    # TODO(synk): at real image sizes do this gather inside the kernel via a
    # strided DMA from the NCHW HBM layout instead of a host-side 6-D transpose.
    B, C, H, W = x.shape
    hp, wp = H // patch, W // patch
    x = x.reshape(B, C, hp, patch, wp, patch)
    x = x.transpose(0, 2, 4, 1, 3, 5)
    return x.reshape(B, hp * wp, C * patch * patch)


def _num_tensorcores():
    # 1 TensorCore per JAX device on v2/v3/v5e/v6e; 2 on v4/v5p (megacore)
    # and v7x.  Only used to decide how many "parallel" grid steps to emit.
    try:
        kind = jax.devices()[0].device_kind.lower()
    except Exception:
        return 1
    if "lite" in kind or "v5e" in kind or "v6" in kind:
        return 1
    if "v4" in kind or "v5p" in kind or "v7" in kind:
        return 2
    return 1


def gmlp_forward(x, params, patch):
    patches = extract_patches(x, patch)
    B, N, K = patches.shape
    D = params["w_pe"].shape[1]
    NC = params["w_h"].shape[1]
    blocks = params["blocks"]
    depths = len(blocks)
    G = blocks[0]["w2"].shape[0]
    CH = 2 * G

    # Grid: one parallel step per TensorCore.  Single-TC chips (v5e/v6e) get a
    # single collapsed step with the whole batch folded into the row axis.
    splits = min(_num_tensorcores(), B)
    if splits < 1 or B % splits != 0:
        splits = 1
    BS = B // splits          # batch elements per grid step
    R = BS * N                # rows per grid step (batch folded into sublanes)

    patches_r = patches.reshape(splits, R, K)
    eye_bs = jnp.eye(BS, dtype=jnp.float32)

    def stack(fn):
        return jnp.stack([fn(b) for b in blocks], axis=0)

    operands = (
        patches_r, params["w_pe"], params["b_pe"],
        stack(lambda b: b["ln1_g"]), stack(lambda b: b["ln1_b"]),
        stack(lambda b: b["w1"]), stack(lambda b: b["b1"]),
        stack(lambda b: b["ln2_g"]), stack(lambda b: b["ln2_b"]),
        # SGU proj as a block-diagonal (R, R) matrix over batch-folded rows.
        stack(lambda b: jnp.kron(eye_bs, b["wp"])),
        stack(lambda b: jnp.tile(b["bp"], (BS, 1))),
        stack(lambda b: b["w2"]), stack(lambda b: b["b2"]),
        # Per-batch sequence-mean pooling as one (BS, R) matmul.
        jnp.kron(eye_bs, jnp.full((1, N), 1.0 / N, jnp.float32)),
        params["w_h"], params["b_h"],
    )

    in_specs = ([pl.BlockSpec((None, R, K), lambda s: (s, 0, 0))]
                + [_full_spec(a) for a in operands[1:]])

    # Advisory cost estimate for XLA's scheduler.
    flops_block = 2 * R * D * CH + 2 * R * R * G + 2 * R * G * D
    flops = splits * (2 * R * K * D + depths * flops_block
                      + 2 * BS * R * D + 2 * BS * D * NC)
    transcendentals = splits * depths * R * CH     # erf per fc1 output elem
    bytes_accessed = (sum(int(a.size) * a.dtype.itemsize for a in operands)
                      + B * NC * 4)
    cost = pl.CostEstimate(flops=int(flops),
                           transcendentals=int(transcendentals),
                           bytes_accessed=int(bytes_accessed))

    kernel = functools.partial(fused_gmlp_kernel, depths=depths, gate_dim=G)
    return pl.pallas_call(
        kernel,
        out_shape=jax.ShapeDtypeStruct((B, NC), jnp.float32),
        grid=(splits,),
        in_specs=in_specs,
        out_specs=pl.BlockSpec((BS, NC), lambda s: (s, 0)),
        compiler_params=pltpu.CompilerParams(
            dimension_semantics=("parallel",)),
        cost_estimate=cost,
    )(*operands)


def gmlp_reference(x, params, patch):
    # Pure-JAX reference of the same forward pass (for a numerical check).
    patches = extract_patches(x, patch)
    tok = patches @ params["w_pe"] + params["b_pe"]
    for p in params["blocks"]:
        h = _layernorm(tok, p["ln1_g"], p["ln1_b"])
        h = h @ p["w1"] + p["b1"]
        h = _gelu_exact(h)
        g = h.shape[-1] // 2
        u, v = h[..., :g], h[..., g:]
        vn = _layernorm(v, p["ln2_g"], p["ln2_b"])
        v_out = jnp.einsum("nm,bmg->bng", p["wp"], vn) + p["bp"]
        tok = (u * v_out) @ p["w2"] + p["b2"]
    pooled = tok.mean(axis=1)
    return pooled @ params["w_h"] + params["b_h"]


# ---------------------------------------------------------------------------
# Main
# ---------------------------------------------------------------------------

if __name__ == "__main__":
    # Small, consistent configuration.
    B, C, IMG, PATCH = 2, 3, 16, 4
    DIM, MLP_RATIO, DEPTHS, NUM_CLASSES = 32, 4, 2, 16
    N = (IMG // PATCH) ** 2          # num_patches = sequence_len = 16
    CH = DIM * MLP_RATIO             # channel_dim = 128
    G = CH // 2                      # gate_dim = 64
    K = C * PATCH * PATCH            # flattened patch dim = 48

    key = jax.random.PRNGKey(0)
    keys = jax.random.split(key, 3 + DEPTHS)
    x = jax.random.normal(keys[0], (B, C, IMG, IMG), jnp.float32)

    def nrm(k, shape, std=0.02):
        return std * jax.random.normal(k, shape, jnp.float32)

    # Patch embedding: Conv2d(kernel=stride=patch) == linear over flat patches.
    kpe = jax.random.split(keys[1], 2)
    params = {
        "w_pe": nrm(kpe[0], (K, DIM), std=0.05),
        "b_pe": nrm(kpe[1], (1, DIM), std=0.05),
        "blocks": [],
    }
    for d in range(DEPTHS):
        kd = jax.random.split(keys[2 + d], 5)
        params["blocks"].append(dict(
            ln1_g=jnp.ones((1, DIM), jnp.float32),
            ln1_b=jnp.zeros((1, DIM), jnp.float32),
            w1=nrm(kd[0], (DIM, CH)),
            b1=nrm(kd[1], (1, CH)),
            ln2_g=jnp.ones((1, G), jnp.float32),
            ln2_b=jnp.zeros((1, G), jnp.float32),
            # SpatialGatingUnit.init_weights style: tiny proj weight, ones bias.
            wp=1e-2 * jax.random.normal(kd[2], (N, N), jnp.float32),
            bp=jnp.ones((N, 1), jnp.float32),
            w2=nrm(kd[3], (G, DIM)),
            b2=nrm(kd[4], (1, DIM)),
        ))
    kh = jax.random.split(keys[2 + DEPTHS], 2)
    params["w_h"] = nrm(kh[0], (DIM, NUM_CLASSES))
    params["b_h"] = nrm(kh[1], (1, NUM_CLASSES))

    out = gmlp_forward(x, params, PATCH)
    out = jax.block_until_ready(out)

    ref = jax.block_until_ready(gmlp_reference(x, params, PATCH))
    assert out.shape == (B, NUM_CLASSES), out.shape
    assert jnp.allclose(out, ref, atol=1e-4, rtol=1e-4), (
        float(jnp.max(jnp.abs(out - ref))))
    print("KERNEL_OK")
</pallas_src>

<mosaic_0001>
module attributes {stable_mosaic.version = 11 : i64} {
  func.func @fused_gmlp_kernel(%arg0: i32, %arg1: memref<1x32x48xf32, #tpu.memory_space<vmem>>, %arg2: memref<48x32xf32, #tpu.memory_space<vmem>>, %arg3: memref<1x32xf32, #tpu.memory_space<vmem>>, %arg4: memref<2x1x32xf32, #tpu.memory_space<vmem>>, %arg5: memref<2x1x32xf32, #tpu.memory_space<vmem>>, %arg6: memref<2x32x128xf32, #tpu.memory_space<vmem>>, %arg7: memref<2x1x128xf32, #tpu.memory_space<vmem>>, %arg8: memref<2x1x64xf32, #tpu.memory_space<vmem>>, %arg9: memref<2x1x64xf32, #tpu.memory_space<vmem>>, %arg10: memref<2x32x32xf32, #tpu.memory_space<vmem>>, %arg11: memref<2x32x1xf32, #tpu.memory_space<vmem>>, %arg12: memref<2x64x32xf32, #tpu.memory_space<vmem>>, %arg13: memref<2x1x32xf32, #tpu.memory_space<vmem>>, %arg14: memref<2x32xf32, #tpu.memory_space<vmem>>, %arg15: memref<32x16xf32, #tpu.memory_space<vmem>>, %arg16: memref<1x16xf32, #tpu.memory_space<vmem>>, %arg17: memref<2x16xf32, #tpu.memory_space<vmem>>) attributes {dimension_semantics = [#tpu.dimension_semantics<parallel>], iteration_bounds = array<i64: 1>, scalar_prefetch = 0 : i64, scratch_operands = 0 : i64, tpu.core_type = #tpu.core_type<tc>, window_params = [{transform_indices = @transform_0, window_bounds = array<i64: 1, 32, 48>}, {pipeline_mode = #tpu.pipeline_mode<synchronous>, transform_indices = @transform_1, window_bounds = array<i64: 48, 32>}, {pipeline_mode = #tpu.pipeline_mode<synchronous>, transform_indices = @transform_2, window_bounds = array<i64: 1, 32>}, {pipeline_mode = #tpu.pipeline_mode<synchronous>, transform_indices = @transform_3, window_bounds = array<i64: 2, 1, 32>}, {pipeline_mode = #tpu.pipeline_mode<synchronous>, transform_indices = @transform_4, window_bounds = array<i64: 2, 1, 32>}, {pipeline_mode = #tpu.pipeline_mode<synchronous>, transform_indices = @transform_5, window_bounds = array<i64: 2, 32, 128>}, {pipeline_mode = #tpu.pipeline_mode<synchronous>, transform_indices = @transform_6, window_bounds = array<i64: 2, 1, 128>}, {pipeline_mode = #tpu.pipeline_mode<synchronous>, transform_indices = @transform_7, window_bounds = array<i64: 2, 1, 64>}, {pipeline_mode = #tpu.pipeline_mode<synchronous>, transform_indices = @transform_8, window_bounds = array<i64: 2, 1, 64>}, {pipeline_mode = #tpu.pipeline_mode<synchronous>, transform_indices = @transform_9, window_bounds = array<i64: 2, 32, 32>}, {pipeline_mode = #tpu.pipeline_mode<synchronous>, transform_indices = @transform_10, window_bounds = array<i64: 2, 32, 1>}, {pipeline_mode = #tpu.pipeline_mode<synchronous>, transform_indices = @transform_11, window_bounds = array<i64: 2, 64, 32>}, {pipeline_mode = #tpu.pipeline_mode<synchronous>, transform_indices = @transform_12, window_bounds = array<i64: 2, 1, 32>}, {pipeline_mode = #tpu.pipeline_mode<synchronous>, transform_indices = @transform_13, window_bounds = array<i64: 2, 32>}, {pipeline_mode = #tpu.pipeline_mode<synchronous>, transform_indices = @transform_14, window_bounds = array<i64: 32, 16>}, {pipeline_mode = #tpu.pipeline_mode<synchronous>, transform_indices = @transform_15, window_bounds = array<i64: 1, 16>}, {transform_indices = @transform_16, window_bounds = array<i64: 2, 16>}]} {
    %c0 = arith.constant 0 : index
    %c0_0 = arith.constant 0 : index
    %c0_1 = arith.constant 0 : index
    %0 = vector.load %arg1[%c0, %c0_0, %c0_1] : memref<1x32x48xf32, #tpu.memory_space<vmem>>, vector<1x32x48xf32>
    %1 = vector.shape_cast %0 : vector<1x32x48xf32> to vector<32x48xf32>
    %c0_2 = arith.constant 0 : index
    %c0_3 = arith.constant 0 : index
    %2 = vector.load %arg2[%c0_2, %c0_3] : memref<48x32xf32, #tpu.memory_space<vmem>>, vector<48x32xf32>
    %cst = arith.constant dense<0.000000e+00> : vector<32x32xf32>
    %3 = tpu.matmul %1, %2, %cst {dimension_numbers = #tpu.dot_dimension_numbers<[1], [0], [0], [1], [0, 0, 1, 1], [], []>} : vector<32x48xf32>, vector<48x32xf32>, vector<32x32xf32> -> vector<32x32xf32>
    %c0_4 = arith.constant 0 : index
    %c0_5 = arith.constant 0 : index
    %4 = vector.load %arg3[%c0_4, %c0_5] : memref<1x32xf32, #tpu.memory_space<vmem>>, vector<1x32xf32>
    %5 = vector.broadcast %4 : vector<1x32xf32> to vector<32x32xf32>
    %6 = arith.addf %3, %5 : vector<32x32xf32>
    %c0_6 = arith.constant 0 : index
    %c0_7 = arith.constant 0 : index
    %c0_8 = arith.constant 0 : index
    %7 = vector.load %arg4[%c0_6, %c0_7, %c0_8] : memref<2x1x32xf32, #tpu.memory_space<vmem>>, vector<1x1x32xf32>
    %8 = vector.shape_cast %7 : vector<1x1x32xf32> to vector<1x32xf32>
    %c0_9 = arith.constant 0 : index
    %c0_10 = arith.constant 0 : index
    %c0_11 = arith.constant 0 : index
    %9 = vector.load %arg5[%c0_9, %c0_10, %c0_11] : memref<2x1x32xf32, #tpu.memory_space<vmem>>, vector<1x1x32xf32>
    %10 = vector.shape_cast %9 : vector<1x1x32xf32> to vector<1x32xf32>
    %cst_12 = arith.constant dense<0.000000e+00> : vector<32xf32>
    %11 = vector.multi_reduction <add>, %6, %cst_12 [1] : vector<32x32xf32> to vector<32xf32>
    %12 = vector.shape_cast %11 : vector<32xf32> to vector<32x1xf32>
    %cst_13 = arith.constant 3.200000e+01 : f32
    %13 = vector.broadcast %cst_13 : f32 to vector<32x1xf32>
    %14 = arith.divf %12, %13 : vector<32x1xf32>
    %15 = vector.broadcast %14 : vector<32x1xf32> to vector<32x32xf32>
    %16 = arith.subf %6, %15 : vector<32x32xf32>
    %17 = arith.mulf %16, %16 : vector<32x32xf32>
    %cst_14 = arith.constant dense<0.000000e+00> : vector<32xf32>
    %18 = vector.multi_reduction <add>, %17, %cst_14 [1] : vector<32x32xf32> to vector<32xf32>
    %19 = vector.shape_cast %18 : vector<32xf32> to vector<32x1xf32>
    %cst_15 = arith.constant 3.200000e+01 : f32
    %20 = vector.broadcast %cst_15 : f32 to vector<32x1xf32>
    %21 = arith.divf %19, %20 : vector<32x1xf32>
    %22 = vector.broadcast %14 : vector<32x1xf32> to vector<32x32xf32>
    %23 = arith.subf %6, %22 : vector<32x32xf32>
    %cst_16 = arith.constant 9.99999974E-6 : f32
    %24 = vector.broadcast %cst_16 : f32 to vector<32x1xf32>
    %25 = arith.addf %21, %24 : vector<32x1xf32>
    %26 = math.rsqrt %25 : vector<32x1xf32>
    %27 = vector.broadcast %26 : vector<32x1xf32> to vector<32x32xf32>
    %28 = arith.mulf %23, %27 : vector<32x32xf32>
    %29 = vector.broadcast %8 : vector<1x32xf32> to vector<32x32xf32>
    %30 = arith.mulf %28, %29 : vector<32x32xf32>
    %31 = vector.broadcast %10 : vector<1x32xf32> to vector<32x32xf32>
    %32 = arith.addf %30, %31 : vector<32x32xf32>
    %c0_17 = arith.constant 0 : index
    %c0_18 = arith.constant 0 : index
    %c0_19 = arith.constant 0 : index
    %33 = vector.load %arg6[%c0_17, %c0_18, %c0_19] : memref<2x32x128xf32, #tpu.memory_space<vmem>>, vector<1x32x128xf32>
    %34 = vector.shape_cast %33 : vector<1x32x128xf32> to vector<32x128xf32>
    %cst_20 = arith.constant dense<0.000000e+00> : vector<32x128xf32>
    %35 = tpu.matmul %32, %34, %cst_20 {dimension_numbers = #tpu.dot_dimension_numbers<[1], [0], [0], [1], [0, 0, 1, 1], [], []>} : vector<32x32xf32>, vector<32x128xf32>, vector<32x128xf32> -> vector<32x128xf32>
    %c0_21 = arith.constant 0 : index
    %c0_22 = arith.constant 0 : index
    %c0_23 = arith.constant 0 : index
    %36 = vector.load %arg7[%c0_21, %c0_22, %c0_23] : memref<2x1x128xf32, #tpu.memory_space<vmem>>, vector<1x1x128xf32>
    %37 = vector.shape_cast %36 : vector<1x1x128xf32> to vector<1x128xf32>
    %38 = vector.broadcast %37 : vector<1x128xf32> to vector<32x128xf32>
    %39 = arith.addf %35, %38 : vector<32x128xf32>
    %cst_24 = arith.constant 5.000000e-01 : f32
    %40 = vector.broadcast %cst_24 : f32 to vector<32x128xf32>
    %41 = arith.mulf %40, %39 : vector<32x128xf32>
    %cst_25 = arith.constant 0.707106769 : f32
    %42 = vector.broadcast %cst_25 : f32 to vector<32x128xf32>
    %43 = arith.mulf %39, %42 : vector<32x128xf32>
    %44 = math.erf %43 : vector<32x128xf32>
    %cst_26 = arith.constant 1.000000e+00 : f32
    %45 = vector.broadcast %cst_26 : f32 to vector<32x128xf32>
    %46 = arith.addf %45, %44 : vector<32x128xf32>
    %47 = arith.mulf %41, %46 : vector<32x128xf32>
    %48 = vector.extract_strided_slice %47 {offsets = [0, 0], sizes = [32, 64], strides = [1, 1]} : vector<32x128xf32> to vector<32x64xf32>
    %49 = vector.extract_strided_slice %47 {offsets = [0, 64], sizes = [32, 64], strides = [1, 1]} : vector<32x128xf32> to vector<32x64xf32>
    %c0_27 = arith.constant 0 : index
    %c0_28 = arith.constant 0 : index
    %c0_29 = arith.constant 0 : index
    %50 = vector.load %arg8[%c0_27, %c0_28, %c0_29] : memref<2x1x64xf32, #tpu.memory_space<vmem>>, vector<1x1x64xf32>
    %51 = vector.shape_cast %50 : vector<1x1x64xf32> to vector<1x64xf32>
    %c0_30 = arith.constant 0 : index
    %c0_31 = arith.constant 0 : index
    %c0_32 = arith.constant 0 : index
    %52 = vector.load %arg9[%c0_30, %c0_31, %c0_32] : memref<2x1x64xf32, #tpu.memory_space<vmem>>, vector<1x1x64xf32>
    %53 = vector.shape_cast %52 : vector<1x1x64xf32> to vector<1x64xf32>
    %cst_33 = arith.constant dense<0.000000e+00> : vector<32xf32>
    %54 = vector.multi_reduction <add>, %49, %cst_33 [1] : vector<32x64xf32> to vector<32xf32>
    %55 = vector.shape_cast %54 : vector<32xf32> to vector<32x1xf32>
    %cst_34 = arith.constant 6.400000e+01 : f32
    %56 = vector.broadcast %cst_34 : f32 to vector<32x1xf32>
    %57 = arith.divf %55, %56 : vector<32x1xf32>
    %58 = vector.broadcast %57 : vector<32x1xf32> to vector<32x64xf32>
    %59 = arith.subf %49, %58 : vector<32x64xf32>
    %60 = arith.mulf %59, %59 : vector<32x64xf32>
    %cst_35 = arith.constant dense<0.000000e+00> : vector<32xf32>
    %61 = vector.multi_reduction <add>, %60, %cst_35 [1] : vector<32x64xf32> to vector<32xf32>
    %62 = vector.shape_cast %61 : vector<32xf32> to vector<32x1xf32>
    %cst_36 = arith.constant 6.400000e+01 : f32
    %63 = vector.broadcast %cst_36 : f32 to vector<32x1xf32>
    %64 = arith.divf %62, %63 : vector<32x1xf32>
    %65 = vector.broadcast %57 : vector<32x1xf32> to vector<32x64xf32>
    %66 = arith.subf %49, %65 : vector<32x64xf32>
    %cst_37 = arith.constant 9.99999974E-6 : f32
    %67 = vector.broadcast %cst_37 : f32 to vector<32x1xf32>
    %68 = arith.addf %64, %67 : vector<32x1xf32>
    %69 = math.rsqrt %68 : vector<32x1xf32>
    %70 = vector.broadcast %69 : vector<32x1xf32> to vector<32x64xf32>
    %71 = arith.mulf %66, %70 : vector<32x64xf32>
    %72 = vector.broadcast %51 : vector<1x64xf32> to vector<32x64xf32>
    %73 = arith.mulf %71, %72 : vector<32x64xf32>
    %74 = vector.broadcast %53 : vector<1x64xf32> to vector<32x64xf32>
    %75 = arith.addf %73, %74 : vector<32x64xf32>
    %c0_38 = arith.constant 0 : index
    %c0_39 = arith.constant 0 : index
    %c0_40 = arith.constant 0 : index
    %76 = vector.load %arg10[%c0_38, %c0_39, %c0_40] : memref<2x32x32xf32, #tpu.memory_space<vmem>>, vector<1x32x32xf32>
    %77 = vector.shape_cast %76 : vector<1x32x32xf32> to vector<32x32xf32>
    %cst_41 = arith.constant dense<0.000000e+00> : vector<32x64xf32>
    %78 = tpu.matmul %77, %75, %cst_41 {dimension_numbers = #tpu.dot_dimension_numbers<[1], [0], [0], [1], [0, 0, 1, 1], [], []>} : vector<32x32xf32>, vector<32x64xf32>, vector<32x64xf32> -> vector<32x64xf32>
    %c0_42 = arith.constant 0 : index
    %c0_43 = arith.constant 0 : index
    %c0_44 = arith.constant 0 : index
    %79 = vector.load %arg11[%c0_42, %c0_43, %c0_44] : memref<2x32x1xf32, #tpu.memory_space<vmem>>, vector<1x32x1xf32>
    %80 = vector.shape_cast %79 : vector<1x32x1xf32> to vector<32x1xf32>
    %81 = vector.broadcast %80 : vector<32x1xf32> to vector<32x64xf32>
    %82 = arith.addf %78, %81 : vector<32x64xf32>
    %83 = arith.mulf %48, %82 : vector<32x64xf32>
    %c0_45 = arith.constant 0 : index
    %c0_46 = arith.constant 0 : index
    %c0_47 = arith.constant 0 : index
    %84 = vector.load %arg12[%c0_45, %c0_46, %c0_47] : memref<2x64x32xf32, #tpu.memory_space<vmem>>, vector<1x64x32xf32>
    %85 = vector.shape_cast %84 : vector<1x64x32xf32> to vector<64x32xf32>
    %cst_48 = arith.constant dense<0.000000e+00> : vector<32x32xf32>
    %86 = tpu.matmul %83, %85, %cst_48 {dimension_numbers = #tpu.dot_dimension_numbers<[1], [0], [0], [1], [0, 0, 1, 1], [], []>} : vector<32x64xf32>, vector<64x32xf32>, vector<32x32xf32> -> vector<32x32xf32>
    %c0_49 = arith.constant 0 : index
    %c0_50 = arith.constant 0 : index
    %c0_51 = arith.constant 0 : index
    %87 = vector.load %arg13[%c0_49, %c0_50, %c0_51] : memref<2x1x32xf32, #tpu.memory_space<vmem>>, vector<1x1x32xf32>
    %88 = vector.shape_cast %87 : vector<1x1x32xf32> to vector<1x32xf32>
    %89 = vector.broadcast %88 : vector<1x32xf32> to vector<32x32xf32>
    %90 = arith.addf %86, %89 : vector<32x32xf32>
    %c1 = arith.constant 1 : index
    %c0_52 = arith.constant 0 : index
    %c0_53 = arith.constant 0 : index
    %91 = vector.load %arg4[%c1, %c0_52, %c0_53] : memref<2x1x32xf32, #tpu.memory_space<vmem>>, vector<1x1x32xf32>
    %92 = vector.shape_cast %91 : vector<1x1x32xf32> to vector<1x32xf32>
    %c1_54 = arith.constant 1 : index
    %c0_55 = arith.constant 0 : index
    %c0_56 = arith.constant 0 : index
    %93 = vector.load %arg5[%c1_54, %c0_55, %c0_56] : memref<2x1x32xf32, #tpu.memory_space<vmem>>, vector<1x1x32xf32>
    %94 = vector.shape_cast %93 : vector<1x1x32xf32> to vector<1x32xf32>
    %cst_57 = arith.constant dense<0.000000e+00> : vector<32xf32>
    %95 = vector.multi_reduction <add>, %90, %cst_57 [1] : vector<32x32xf32> to vector<32xf32>
    %96 = vector.shape_cast %95 : vector<32xf32> to vector<32x1xf32>
    %cst_58 = arith.constant 3.200000e+01 : f32
    %97 = vector.broadcast %cst_58 : f32 to vector<32x1xf32>
    %98 = arith.divf %96, %97 : vector<32x1xf32>
    %99 = vector.broadcast %98 : vector<32x1xf32> to vector<32x32xf32>
    %100 = arith.subf %90, %99 : vector<32x32xf32>
    %101 = arith.mulf %100, %100 : vector<32x32xf32>
    %cst_59 = arith.constant dense<0.000000e+00> : vector<32xf32>
    %102 = vector.multi_reduction <add>, %101, %cst_59 [1] : vector<32x32xf32> to vector<32xf32>
    %103 = vector.shape_cast %102 : vector<32xf32> to vector<32x1xf32>
    %cst_60 = arith.constant 3.200000e+01 : f32
    %104 = vector.broadcast %cst_60 : f32 to vector<32x1xf32>
    %105 = arith.divf %103, %104 : vector<32x1xf32>
    %106 = vector.broadcast %98 : vector<32x1xf32> to vector<32x32xf32>
    %107 = arith.subf %90, %106 : vector<32x32xf32>
    %cst_61 = arith.constant 9.99999974E-6 : f32
    %108 = vector.broadcast %cst_61 : f32 to vector<32x1xf32>
    %109 = arith.addf %105, %108 : vector<32x1xf32>
    %110 = math.rsqrt %109 : vector<32x1xf32>
    %111 = vector.broadcast %110 : vector<32x1xf32> to vector<32x32xf32>
    %112 = arith.mulf %107, %111 : vector<32x32xf32>
    %113 = vector.broadcast %92 : vector<1x32xf32> to vector<32x32xf32>
    %114 = arith.mulf %112, %113 : vector<32x32xf32>
    %115 = vector.broadcast %94 : vector<1x32xf32> to vector<32x32xf32>
    %116 = arith.addf %114, %115 : vector<32x32xf32>
    %c1_62 = arith.constant 1 : index
    %c0_63 = arith.constant 0 : index
    %c0_64 = arith.constant 0 : index
    %117 = vector.load %arg6[%c1_62, %c0_63, %c0_64] : memref<2x32x128xf32, #tpu.memory_space<vmem>>, vector<1x32x128xf32>
    %118 = vector.shape_cast %117 : vector<1x32x128xf32> to vector<32x128xf32>
    %cst_65 = arith.constant dense<0.000000e+00> : vector<32x128xf32>
    %119 = tpu.matmul %116, %118, %cst_65 {dimension_numbers = #tpu.dot_dimension_numbers<[1], [0], [0], [1], [0, 0, 1, 1], [], []>} : vector<32x32xf32>, vector<32x128xf32>, vector<32x128xf32> -> vector<32x128xf32>
    %c1_66 = arith.constant 1 : index
    %c0_67 = arith.constant 0 : index
    %c0_68 = arith.constant 0 : index
    %120 = vector.load %arg7[%c1_66, %c0_67, %c0_68] : memref<2x1x128xf32, #tpu.memory_space<vmem>>, vector<1x1x128xf32>
    %121 = vector.shape_cast %120 : vector<1x1x128xf32> to vector<1x128xf32>
    %122 = vector.broadcast %121 : vector<1x128xf32> to vector<32x128xf32>
    %123 = arith.addf %119, %122 : vector<32x128xf32>
    %cst_69 = arith.constant 5.000000e-01 : f32
    %124 = vector.broadcast %cst_69 : f32 to vector<32x128xf32>
    %125 = arith.mulf %124, %123 : vector<32x128xf32>
    %cst_70 = arith.constant 0.707106769 : f32
    %126 = vector.broadcast %cst_70 : f32 to vector<32x128xf32>
    %127 = arith.mulf %123, %126 : vector<32x128xf32>
    %128 = math.erf %127 : vector<32x128xf32>
    %cst_71 = arith.constant 1.000000e+00 : f32
    %129 = vector.broadcast %cst_71 : f32 to vector<32x128xf32>
    %130 = arith.addf %129, %128 : vector<32x128xf32>
    %131 = arith.mulf %125, %130 : vector<32x128xf32>
    %132 = vector.extract_strided_slice %131 {offsets = [0, 0], sizes = [32, 64], strides = [1, 1]} : vector<32x128xf32> to vector<32x64xf32>
    %133 = vector.extract_strided_slice %131 {offsets = [0, 64], sizes = [32, 64], strides = [1, 1]} : vector<32x128xf32> to vector<32x64xf32>
    %c1_72 = arith.constant 1 : index
    %c0_73 = arith.constant 0 : index
    %c0_74 = arith.constant 0 : index
    %134 = vector.load %arg8[%c1_72, %c0_73, %c0_74] : memref<2x1x64xf32, #tpu.memory_space<vmem>>, vector<1x1x64xf32>
    %135 = vector.shape_cast %134 : vector<1x1x64xf32> to vector<1x64xf32>
    %c1_75 = arith.constant 1 : index
    %c0_76 = arith.constant 0 : index
    %c0_77 = arith.constant 0 : index
    %136 = vector.load %arg9[%c1_75, %c0_76, %c0_77] : memref<2x1x64xf32, #tpu.memory_space<vmem>>, vector<1x1x64xf32>
    %137 = vector.shape_cast %136 : vector<1x1x64xf32> to vector<1x64xf32>
    %cst_78 = arith.constant dense<0.000000e+00> : vector<32xf32>
    %138 = vector.multi_reduction <add>, %133, %cst_78 [1] : vector<32x64xf32> to vector<32xf32>
    %139 = vector.shape_cast %138 : vector<32xf32> to vector<32x1xf32>
    %cst_79 = arith.constant 6.400000e+01 : f32
    %140 = vector.broadcast %cst_79 : f32 to vector<32x1xf32>
    %141 = arith.divf %139, %140 : vector<32x1xf32>
    %142 = vector.broadcast %141 : vector<32x1xf32> to vector<32x64xf32>
    %143 = arith.subf %133, %142 : vector<32x64xf32>
    %144 = arith.mulf %143, %143 : vector<32x64xf32>
    %cst_80 = arith.constant dense<0.000000e+00> : vector<32xf32>
    %145 = vector.multi_reduction <add>, %144, %cst_80 [1] : vector<32x64xf32> to vector<32xf32>
    %146 = vector.shape_cast %145 : vector<32xf32> to vector<32x1xf32>
    %cst_81 = arith.constant 6.400000e+01 : f32
    %147 = vector.broadcast %cst_81 : f32 to vector<32x1xf32>
    %148 = arith.divf %146, %147 : vector<32x1xf32>
    %149 = vector.broadcast %141 : vector<32x1xf32> to vector<32x64xf32>
    %150 = arith.subf %133, %149 : vector<32x64xf32>
    %cst_82 = arith.constant 9.99999974E-6 : f32
    %151 = vector.broadcast %cst_82 : f32 to vector<32x1xf32>
    %152 = arith.addf %148, %151 : vector<32x1xf32>
    %153 = math.rsqrt %152 : vector<32x1xf32>
    %154 = vector.broadcast %153 : vector<32x1xf32> to vector<32x64xf32>
    %155 = arith.mulf %150, %154 : vector<32x64xf32>
    %156 = vector.broadcast %135 : vector<1x64xf32> to vector<32x64xf32>
    %157 = arith.mulf %155, %156 : vector<32x64xf32>
    %158 = vector.broadcast %137 : vector<1x64xf32> to vector<32x64xf32>
    %159 = arith.addf %157, %158 : vector<32x64xf32>
    %c1_83 = arith.constant 1 : index
    %c0_84 = arith.constant 0 : index
    %c0_85 = arith.constant 0 : index
    %160 = vector.load %arg10[%c1_83, %c0_84, %c0_85] : memref<2x32x32xf32, #tpu.memory_space<vmem>>, vector<1x32x32xf32>
    %161 = vector.shape_cast %160 : vector<1x32x32xf32> to vector<32x32xf32>
    %cst_86 = arith.constant dense<0.000000e+00> : vector<32x64xf32>
    %162 = tpu.matmul %161, %159, %cst_86 {dimension_numbers = #tpu.dot_dimension_numbers<[1], [0], [0], [1], [0, 0, 1, 1], [], []>} : vector<32x32xf32>, vector<32x64xf32>, vector<32x64xf32> -> vector<32x64xf32>
    %c1_87 = arith.constant 1 : index
    %c0_88 = arith.constant 0 : index
    %c0_89 = arith.constant 0 : index
    %163 = vector.load %arg11[%c1_87, %c0_88, %c0_89] : memref<2x32x1xf32, #tpu.memory_space<vmem>>, vector<1x32x1xf32>
    %164 = vector.shape_cast %163 : vector<1x32x1xf32> to vector<32x1xf32>
    %165 = vector.broadcast %164 : vector<32x1xf32> to vector<32x64xf32>
    %166 = arith.addf %162, %165 : vector<32x64xf32>
    %167 = arith.mulf %132, %166 : vector<32x64xf32>
    %c1_90 = arith.constant 1 : index
    %c0_91 = arith.constant 0 : index
    %c0_92 = arith.constant 0 : index
    %168 = vector.load %arg12[%c1_90, %c0_91, %c0_92] : memref<2x64x32xf32, #tpu.memory_space<vmem>>, vector<1x64x32xf32>
    %169 = vector.shape_cast %168 : vector<1x64x32xf32> to vector<64x32xf32>
    %cst_93 = arith.constant dense<0.000000e+00> : vector<32x32xf32>
    %170 = tpu.matmul %167, %169, %cst_93 {dimension_numbers = #tpu.dot_dimension_numbers<[1], [0], [0], [1], [0, 0, 1, 1], [], []>} : vector<32x64xf32>, vector<64x32xf32>, vector<32x32xf32> -> vector<32x32xf32>
    %c1_94 = arith.constant 1 : index
    %c0_95 = arith.constant 0 : index
    %c0_96 = arith.constant 0 : index
    %171 = vector.load %arg13[%c1_94, %c0_95, %c0_96] : memref<2x1x32xf32, #tpu.memory_space<vmem>>, vector<1x1x32xf32>
    %172 = vector.shape_cast %171 : vector<1x1x32xf32> to vector<1x32xf32>
    %173 = vector.broadcast %172 : vector<1x32xf32> to vector<32x32xf32>
    %174 = arith.addf %170, %173 : vector<32x32xf32>
    %c0_97 = arith.constant 0 : index
    %c0_98 = arith.constant 0 : index
    %175 = vector.load %arg14[%c0_97, %c0_98] : memref<2x32xf32, #tpu.memory_space<vmem>>, vector<2x32xf32>
    %cst_99 = arith.constant dense<0.000000e+00> : vector<2x32xf32>
    %176 = tpu.matmul %175, %174, %cst_99 {dimension_numbers = #tpu.dot_dimension_numbers<[1], [0], [0], [1], [0, 0, 1, 1], [], []>} : vector<2x32xf32>, vector<32x32xf32>, vector<2x32xf32> -> vector<2x32xf32>
    %c0_100 = arith.constant 0 : index
    %c0_101 = arith.constant 0 : index
    %177 = vector.load %arg15[%c0_100, %c0_101] : memref<32x16xf32, #tpu.memory_space<vmem>>, vector<32x16xf32>
    %cst_102 = arith.constant dense<0.000000e+00> : vector<2x16xf32>
    %178 = tpu.matmul %176, %177, %cst_102 {dimension_numbers = #tpu.dot_dimension_numbers<[1], [0], [0], [1], [0, 0, 1, 1], [], []>} : vector<2x32xf32>, vector<32x16xf32>, vector<2x16xf32> -> vector<2x16xf32>
    %c0_103 = arith.constant 0 : index
    %c0_104 = arith.constant 0 : index
    %179 = vector.load %arg16[%c0_103, %c0_104] : memref<1x16xf32, #tpu.memory_space<vmem>>, vector<1x16xf32>
    %180 = vector.broadcast %179 : vector<1x16xf32> to vector<2x16xf32>
    %181 = arith.addf %178, %180 : vector<2x16xf32>
    %c0_105 = arith.constant 0 : index
    %c0_106 = arith.constant 0 : index
    %182 = vector.load %arg17[%c0_105, %c0_106] : memref<2x16xf32, #tpu.memory_space<vmem>>, vector<2x16xf32>
    tpu.vector_store %arg17[%c0_105, %c0_106], %181 {strides = array<i32>} : memref<2x16xf32, #tpu.memory_space<vmem>>, vector<2x16xf32>,
    return
  }
  func.func @transform_0(%arg0: i32) -> (i32, i32, i32) {
    %c0_i32 = arith.constant 0 : i32
    %c0_i32_0 = arith.constant 0 : i32
    %c0_i32_1 = arith.constant 0 : i32
    return %arg0, %c0_i32, %c0_i32_0 : i32, i32, i32
  }
  func.func @transform_1(%arg0: i32) -> (i32, i32) {
    %c0_i32 = arith.constant 0 : i32
    %c0_i32_0 = arith.constant 0 : i32
    %c0_i32_1 = arith.constant 0 : i32
    return %c0_i32, %c0_i32_0 : i32, i32
  }
  func.func @transform_2(%arg0: i32) -> (i32, i32) {
    %c0_i32 = arith.constant 0 : i32
    %c0_i32_0 = arith.constant 0 : i32
    %c0_i32_1 = arith.constant 0 : i32
    return %c0_i32, %c0_i32_0 : i32, i32
  }
  func.func @transform_3(%arg0: i32) -> (i32, i32, i32) {
    %c0_i32 = arith.constant 0 : i32
    %c0_i32_0 = arith.constant 0 : i32
    %c0_i32_1 = arith.constant 0 : i32
    %c0_i32_2 = arith.constant 0 : i32
    return %c0_i32, %c0_i32_0, %c0_i32_1 : i32, i32, i32
  }
  func.func @transform_4(%arg0: i32) -> (i32, i32, i32) {
    %c0_i32 = arith.constant 0 : i32
    %c0_i32_0 = arith.constant 0 : i32
    %c0_i32_1 = arith.constant 0 : i32
    %c0_i32_2 = arith.constant 0 : i32
    return %c0_i32, %c0_i32_0, %c0_i32_1 : i32, i32, i32
  }
  func.func @transform_5(%arg0: i32) -> (i32, i32, i32) {
    %c0_i32 = arith.constant 0 : i32
    %c0_i32_0 = arith.constant 0 : i32
    %c0_i32_1 = arith.constant 0 : i32
    %c0_i32_2 = arith.constant 0 : i32
    return %c0_i32, %c0_i32_0, %c0_i32_1 : i32, i32, i32
  }
  func.func @transform_6(%arg0: i32) -> (i32, i32, i32) {
    %c0_i32 = arith.constant 0 : i32
    %c0_i32_0 = arith.constant 0 : i32
    %c0_i32_1 = arith.constant 0 : i32
    %c0_i32_2 = arith.constant 0 : i32
    return %c0_i32, %c0_i32_0, %c0_i32_1 : i32, i32, i32
  }
  func.func @transform_7(%arg0: i32) -> (i32, i32, i32) {
    %c0_i32 = arith.constant 0 : i32
    %c0_i32_0 = arith.constant 0 : i32
    %c0_i32_1 = arith.constant 0 : i32
    %c0_i32_2 = arith.constant 0 : i32
    return %c0_i32, %c0_i32_0, %c0_i32_1 : i32, i32, i32
  }
  func.func @transform_8(%arg0: i32) -> (i32, i32, i32) {
    %c0_i32 = arith.constant 0 : i32
    %c0_i32_0 = arith.constant 0 : i32
    %c0_i32_1 = arith.constant 0 : i32
    %c0_i32_2 = arith.constant 0 : i32
    return %c0_i32, %c0_i32_0, %c0_i32_1 : i32, i32, i32
  }
  func.func @transform_9(%arg0: i32) -> (i32, i32, i32) {
    %c0_i32 = arith.constant 0 : i32
    %c0_i32_0 = arith.constant 0 : i32
    %c0_i32_1 = arith.constant 0 : i32
    %c0_i32_2 = arith.constant 0 : i32
    return %c0_i32, %c0_i32_0, %c0_i32_1 : i32, i32, i32
  }
  func.func @transform_10(%arg0: i32) -> (i32, i32, i32) {
    %c0_i32 = arith.constant 0 : i32
    %c0_i32_0 = arith.constant 0 : i32
    %c0_i32_1 = arith.constant 0 : i32
    %c0_i32_2 = arith.constant 0 : i32
    return %c0_i32, %c0_i32_0, %c0_i32_1 : i32, i32, i32
  }
  func.func @transform_11(%arg0: i32) -> (i32, i32, i32) {
    %c0_i32 = arith.constant 0 : i32
    %c0_i32_0 = arith.constant 0 : i32
    %c0_i32_1 = arith.constant 0 : i32
    %c0_i32_2 = arith.constant 0 : i32
    return %c0_i32, %c0_i32_0, %c0_i32_1 : i32, i32, i32
  }
  func.func @transform_12(%arg0: i32) -> (i32, i32, i32) {
    %c0_i32 = arith.constant 0 : i32
    %c0_i32_0 = arith.constant 0 : i32
    %c0_i32_1 = arith.constant 0 : i32
    %c0_i32_2 = arith.constant 0 : i32
    return %c0_i32, %c0_i32_0, %c0_i32_1 : i32, i32, i32
  }
  func.func @transform_13(%arg0: i32) -> (i32, i32) {
    %c0_i32 = arith.constant 0 : i32
    %c0_i32_0 = arith.constant 0 : i32
    %c0_i32_1 = arith.constant 0 : i32
    return %c0_i32, %c0_i32_0 : i32, i32
  }
  func.func @transform_14(%arg0: i32) -> (i32, i32) {
    %c0_i32 = arith.constant 0 : i32
    %c0_i32_0 = arith.constant 0 : i32
    %c0_i32_1 = arith.constant 0 : i32
    return %c0_i32, %c0_i32_0 : i32, i32
  }
  func.func @transform_15(%arg0: i32) -> (i32, i32) {
    %c0_i32 = arith.constant 0 : i32
    %c0_i32_0 = arith.constant 0 : i32
    %c0_i32_1 = arith.constant 0 : i32
    return %c0_i32, %c0_i32_0 : i32, i32
  }
  func.func @transform_16(%arg0: i32) -> (i32, i32) {
    %c0_i32 = arith.constant 0 : i32
    %c0_i32_0 = arith.constant 0 : i32
    return %arg0, %c0_i32 : i32, i32
  }
}

</mosaic_0001>

<bundles_post_ra>
// kernel: tpu_custom_call.1
= control target key start
LH: loop header
LB: loop body
LE: loop exit
PB: predicated region body
PF: predicated region fallthrough
CT: control target
= control target key end

     0   :  { %s2337_s0 = inlined_call_operand.vmem [shape: f32[1,32,48], index: 0, kind: input, shape index: {}]   ;;  %s2338_s1 = inlined_call_operand.vmem [shape: f32[48,32], index: 1, kind: input, shape index: {}]   ;;  %s2339_s2 = inlined_call_operand.vmem [shape: f32[1,32], index: 2, kind: input, shape index: {}]   ;;  %s2340_s3 = inlined_call_operand.vmem [shape: f32[2,1,32], index: 3, kind: input, shape index: {}]   ;;  %s2341_s4 = inlined_call_operand.vmem [shape: f32[2,1,32], index: 4, kind: input, shape index: {}]   ;;  %s2342_s5 = inlined_call_operand.vmem [shape: f32[2,32,128], index: 5, kind: input, shape index: {}]   ;;  %s2343_s6 = inlined_call_operand.vmem [shape: f32[2,1,128], index: 6, kind: input, shape index: {}]   ;;  %s2344_s7 = inlined_call_operand.vmem [shape: f32[2,1,64], index: 7, kind: input, shape index: {}]   ;;  %s2345_s8 = inlined_call_operand.vmem [shape: f32[2,1,64], index: 8, kind: input, shape index: {}]   ;;  %s2346_s9 = inlined_call_operand.vmem [shape: f32[2,32,32], index: 9, kind: input, shape index: {}]   ;;  %s2347_s10 = inlined_call_operand.vmem [shape: f32[2,32,1], index: 10, kind: input, shape index: {}]   ;;  %s2348_s11 = inlined_call_operand.vmem [shape: f32[2,64,32], index: 11, kind: input, shape index: {}]   ;;  %s2349_s12 = inlined_call_operand.vmem [shape: f32[2,1,32], index: 12, kind: input, shape index: {}]   ;;  %s2350_s13 = inlined_call_operand.vmem [shape: f32[2,32], index: 13, kind: input, shape index: {}]   ;;  %s2351_s14 = inlined_call_operand.vmem [shape: f32[32,16], index: 14, kind: input, shape index: {}]   ;;  %s2352_s15 = inlined_call_operand.vmem [shape: f32[1,16], index: 15, kind: input, shape index: {}]   ;;  %s2353_s16 = inlined_call_operand.hbm [shape: f32[2,16], index: 16, kind: output, shape index: {}]  }
   0x1   :  { %2355 = sst [smem:[#allocation5_spill]] %s2337_s0 }
   0x2   :  { %v63_v0 = vld [vmem:[%s2338_s1 + $0x28] sm:$0xff]  ;;  %v62_v1 = vld [vmem:[%s2338_s1 + $0x20] sm:$0xff]  ;;  %v61_v2 = vld [vmem:[%s2338_s1 + $0x18] sm:$0xff] }
   0x3   :  { %91 = vmatpush.msra.mxu0 %v63_v0  ;;  %v60_v3 = vld [vmem:[%s2338_s1 + $0x10] sm:$0xff]  ;;  %v59_v4 = vld [vmem:[%s2338_s1 + $0x8] sm:$0xff]  ;;  %v58_v5 = vld [vmem:[%s2338_s1] sm:$0xff] }
   0x5   :  { %92 = vmatpush.msra.mxu0 %v62_v1 }
   0x7   :  { %93 = vmatpush.msra.mxu0 %v61_v2 }
   0x9   :  { %94 = vmatpush.msra.mxu0 %v60_v3 }
   0xa   :  { %21 = vsyncpa [#allocation3], 0  ;;  %s2356_s20 = sld [smem:[#allocation5_spill]]  ;;  %vm68_vm0 = vcmask 392192   ;;  %v1523_v10 = vld [vmem:[%s2339_s2] ss:$0 sm:$0xff] }
   0xb   :  { %95 = vmatpush.msra.mxu0 %v59_v4  ;;  %vm112_vm1 = vcmask 261120   ;;  %v1615_v23 = vmov 32.0   ;;  %v225_v50 = vld [vmem:[%s2342_s5 + $0x18] sm:$0xff]  ;;  %v224_v51 = vld [vmem:[%s2342_s5 + $0x10] sm:$0xff]  ;;  %v223_v52 = vld [vmem:[%s2342_s5 + $0x8] sm:$0xff]  ;;  %s1616_s25 = smov 64  }
   0xc   :  { %1537 = vrcp.f32 %v1615_v23  ;;  %254 = vmatpush.msra.mxu1 %v225_v50  ;;  %v222_v53 = vld [vmem:[%s2342_s5] sm:$0xff]  ;;  %s1422_s2 = sshll.u32 %s2353_s16, 4  ;;  %s1423_s2 = int_to_ptr.hbm [resolvable:$true] %s1422_s2 }
   0xd   :  { %96 = vmatpush.msra.mxu0 %v58_v5 }
   0xe   :  { %255 = vmatpush.msra.mxu1 %v224_v51 }
  0x10   :  { %v54_v6 = vld [vmem:[%s2356_s20] sm:$0xff]  ;;  %v55_v7 = vld [vmem:[%s2356_s20 + $0x8] sm:$0xff]  ;;  %v56_v8 = vld [vmem:[%s2356_s20 + $0x10] sm:$0xff]  ;;  %256 = vmatpush.msra.mxu1 %v223_v52 }
  0x11   :  { %1431 = vmatmul.msk.f32.vlgmr.msra.gmra.mxu0 %vm68_vm0, %v54_v6  ;;  %v57_v9 = vld [vmem:[%s2356_s20 + $0x18] sm:$0xff] }
  0x12   :  { %v1538_v24 = vpop.eup %1537  ;;  %257 = vmatpush.msra.mxu1 %v222_v53 }
  0x13   :  { %v126_v25 = vmul.f32 32.0, %v1538_v24  ;;  %vm130_vm2 = vweird.f32 %v1538_v24 }
  0x15   :  { %v127_v26 = vsub.f32 1.0, %v126_v25 }
  0x17   :  { %v128_v27 = vmul.f32 %v1538_v24, %v127_v26 }
  0x19   :  { %1432 = vmatmul.msk.f32.gmra.mxu0 %vm68_vm0, %v55_v7  ;;  %v129_v28 = vadd.f32 %v1538_v24, %v128_v27  ;;  %v1524_v7 = vld [vmem:[%s2340_s3] ss:$0 sm:$0xff] }
  0x1b   :  { %v1742_v29 = vsel %vm130_vm2, %v1538_v24, %v129_v28 }
  0x21   :  { %1433 = vmatmul.msk.f32.gmra.mxu0 %vm68_vm0, %v56_v8 }
  0x29   :  { %1434 = vmatmul.msk.f32.gmra.mxu0 %vm68_vm0, %v57_v9 }
  0x8e   :  { %v98_v11 = vpop.f32.mrf.mxu0 }
  0x8f   :  { %v99_v12 = vadd.f32 %v1523_v10, %v98_v11  ;;  %v1525_v11 = vld [vmem:[%s2341_s4] ss:$0 sm:$0xff] }
  0x91   :  { %v113_v13 = vsel %vm112_vm1, %v99_v12, 0.0 }
  0x92   :  { %114 = vadd.xlane.f32.xlu0 %v113_v13 }
  0x96   :  { %v101_v14 = vpop.f32.mrf.mxu0 }
  0x97   :  { %v102_v15 = vadd.f32 %v1523_v10, %v101_v14 }
  0x99   :  { %v116_v16 = vsel %vm112_vm1, %v102_v15, 0.0 }
  0x9a   :  { %117 = vadd.xlane.f32.xlu0 %v116_v16 }
  0x9e   :  { %v104_v17 = vpop.f32.mrf.mxu0 }
  0x9f   :  { %v105_v18 = vadd.f32 %v1523_v10, %v104_v17 }
  0xa1   :  { %v119_v19 = vsel %vm112_vm1, %v105_v18, 0.0 }
  0xa2   :  { %120 = vadd.xlane.f32.xlu1 %v119_v19 }
  0xa6   :  { %v107_v20 = vpop.f32.mrf.mxu0 }
  0xa7   :  { %v108_v21 = vadd.f32 %v1523_v10, %v107_v20 }
  0xa9   :  { %v122_v22 = vsel %vm112_vm1, %v108_v21, 0.0 }
  0xaa   :  { %123 = vadd.xlane.f32.xlu1 %v122_v22 }
 0x105   :  { %v115_v30 = vpop.xlane.xlu0 %114 }
 0x106   :  { %v132_v31 = vmul.f32 %v1742_v29, %v115_v30 }
 0x108   :  { %v136_v32 = vsub.f32 %v99_v12, %v132_v31 }
 0x10a   :  { %v140_v33 = vmul.f32 %v136_v32, %v136_v32 }
 0x10c   :  { %v144_v34 = vsel %vm112_vm1, %v140_v33, 0.0 }
 0x10d   :  { %145 = vadd.xlane.f32.xlu2 %v144_v34  ;;  %v118_v35 = vpop.xlane.xlu0 %117 }
 0x10e   :  { %v133_v36 = vmul.f32 %v1742_v29, %v118_v35 }
 0x110   :  { %v1747_v37 = vsub.f32 %v102_v15, %v133_v36 }
 0x112   :  { %v141_v38 = vmul.f32 %v1747_v37, %v1747_v37 }
 0x114   :  { %v147_v39 = vsel %vm112_vm1, %v141_v38, 0.0 }
 0x115   :  { %v121_v40 = vpop.xlane.xlu1 %120  ;;  %148 = vadd.xlane.f32.xlu2 %v147_v39 }
 0x116   :  { %v134_v41 = vmul.f32 %v1742_v29, %v121_v40 }
 0x118   :  { %v1753_v42 = vsub.f32 %v105_v18, %v134_v41 }
 0x11a   :  { %v142_v43 = vmul.f32 %v1753_v42, %v1753_v42 }
 0x11c   :  { %v150_v44 = vsel %vm112_vm1, %v142_v43, 0.0 }
 0x11d   :  { %v124_v45 = vpop.xlane.xlu1 %123  ;;  %151 = vadd.xlane.f32.xlu0 %v150_v44 }
 0x11e   :  { %v135_v46 = vmul.f32 %v1742_v29, %v124_v45 }
 0x120   :  { %v1759_v47 = vsub.f32 %v108_v21, %v135_v46 }
 0x122   :  { %v143_v48 = vmul.f32 %v1759_v47, %v1759_v47 }
 0x124   :  { %v153_v49 = vsel %vm112_vm1, %v143_v48, 0.0 }
 0x125   :  { %154 = vadd.xlane.f32.xlu1 %v153_v49 }
 0x180   :  { %v146_v54 = vpop.xlane.xlu2 %145 }
 0x181   :  { %v156_v55 = vmul.f32 %v146_v54, %v1742_v29 }
 0x183   :  { %v160_v56 = vadd.f32 1e-05, %v156_v55 }
 0x185   :  { %1539 = vrsqrt.f32 %v160_v56  ;;  %vm170_vm4 = vweird.f32 %v160_v56 }
 0x188   :  { %v149_v57 = vpop.xlane.xlu2 %148 }
 0x189   :  { %v157_v58 = vmul.f32 %v149_v57, %v1742_v29 }
 0x18b   :  { %v1540_v59 = vpop.eup %1539  ;;  %v161_v60 = vadd.f32 1e-05, %v157_v58 }
 0x18c   :  { %v165_v61 = vmul.f32 %v1540_v59, %v160_v56  ;;  %vm171_vm3 = vweird.f32 %v1540_v59 }
 0x18d   :  { %1541 = vrsqrt.f32 %v161_v60  ;;  %vm172_vm5 = vmor %vm170_vm4, %vm171_vm3  ;;  %vm180_vm7 = vweird.f32 %v161_v60 }
 0x18e   :  { %v166_v62 = vmul.f32 %v1540_v59, %v165_v61 }
 0x190   :  { %v167_v63 = vmul.f32 0.5, %v166_v62  ;;  %v152_v0 = vpop.xlane.xlu0 %151 }
 0x191   :  { %v158_v1 = vmul.f32 %v152_v0, %v1742_v29 }
 0x192   :  { %v168_v2 = vsub.f32 1.5, %v167_v63 }
 0x193   :  { %v1542_v3 = vpop.eup %1541  ;;  %v162_v4 = vadd.f32 1e-05, %v158_v1 }
 0x194   :  { %v169_v5 = vmul.f32 %v1540_v59, %v168_v2  ;;  %v175_v6 = vmul.f32 %v1542_v3, %v161_v60  ;;  %vm181_vm6 = vweird.f32 %v1542_v3 }
 0x195   :  { %1543 = vrsqrt.f32 %v162_v4  ;;  %vm182_vm8 = vmor %vm180_vm7, %vm181_vm6  ;;  %vm190_vm10 = vweird.f32 %v162_v4 }
 0x196   :  { %v173_v8 = vsel %vm172_vm5, %v1540_v59, %v169_v5  ;;  %v176_v9 = vmul.f32 %v1542_v3, %v175_v6 }
 0x197   :  { %v204_v10 = vmul.f32 %v173_v8, %v136_v32 }
 0x198   :  { %v177_v12 = vmul.f32 0.5, %v176_v9  ;;  %v155_v13 = vpop.xlane.xlu1 %154 }
 0x199   :  { %v159_v14 = vmul.f32 %v155_v13, %v1742_v29  ;;  %v211_v15 = vmul.f32 %v1524_v7, %v204_v10 }
 0x19a   :  { %v178_v16 = vsub.f32 1.5, %v177_v12 }
 0x19b   :  { %v1544_v17 = vpop.eup %1543  ;;  %v163_v18 = vadd.f32 1e-05, %v159_v14  ;;  %v218_v19 = vadd.f32 %v1525_v11, %v211_v15 }
 0x19c   :  { %v179_v20 = vmul.f32 %v1542_v3, %v178_v16  ;;  %v185_v21 = vmul.f32 %v1544_v17, %v162_v4  ;;  %vm191_vm9 = vweird.f32 %v1544_v17 }
 0x19d   :  { %1545 = vrsqrt.f32 %v163_v18  ;;  %1435 = vmatmul.msk.f32.vlgmr.msra.gmra.mxu1 %vm112_vm1, %v218_v19  ;;  %vm192_vm11 = vmor %vm190_vm10, %vm191_vm9  ;;  %vm200_vm13 = vweird.f32 %v163_v18 }
 0x19e   :  { %v183_v22 = vsel %vm182_vm8, %v1542_v3, %v179_v20  ;;  %v186_v23 = vmul.f32 %v1544_v17, %v185_v21 }
 0x19f   :  { %v205_v24 = vmul.f32 %v183_v22, %v1747_v37 }
 0x1a0   :  { %v187_v25 = vmul.f32 0.5, %v186_v23 }
 0x1a1   :  { %v212_v26 = vmul.f32 %v1524_v7, %v205_v24 }
 0x1a2   :  { %v188_v27 = vsub.f32 1.5, %v187_v25 }
 0x1a3   :  { %v1546_v28 = vpop.eup %1545  ;;  %v219_v30 = vadd.f32 %v1525_v11, %v212_v26 }
 0x1a4   :  { %v189_v31 = vmul.f32 %v1544_v17, %v188_v27  ;;  %v195_v32 = vmul.f32 %v1546_v28, %v163_v18  ;;  %vm201_vm12 = vweird.f32 %v1546_v28 }
 0x1a5   :  { %1436 = vmatmul.msk.f32.gmra.mxu1 %vm112_vm1, %v219_v30  ;;  %vm202_vm14 = vmor %vm200_vm13, %vm201_vm12 }
 0x1a6   :  { %v193_v33 = vsel %vm192_vm11, %v1544_v17, %v189_v31  ;;  %v196_v34 = vmul.f32 %v1546_v28, %v195_v32 }
 0x1a7   :  { %v206_v35 = vmul.f32 %v193_v33, %v1753_v42  ;;  %v1526_v42 = vld [vmem:[%s2343_s6] ss:$0 sm:$0xff] }
 0x1a8   :  { %v197_v36 = vmul.f32 0.5, %v196_v34 }
 0x1a9   :  { %v213_v38 = vmul.f32 %v1524_v7, %v206_v35 }
 0x1aa   :  { %v198_v39 = vsub.f32 1.5, %v197_v36 }
 0x1ab   :  { %v220_v37 = vadd.f32 %v1525_v11, %v213_v38 }
 0x1ac   :  { %v199_v40 = vmul.f32 %v1546_v28, %v198_v39 }
 0x1ad   :  { %1437 = vmatmul.msk.f32.gmra.mxu1 %vm112_vm1, %v220_v37 }
 0x1ae   :  { %v203_v41 = vsel %vm202_vm14, %v1546_v28, %v199_v40 }
 0x1af   :  { %v207_v43 = vmul.f32 %v203_v41, %v1759_v47 }
 0x1b1   :  { %v214_v44 = vmul.f32 %v1524_v7, %v207_v43 }
 0x1b3   :  { %v221_v45 = vadd.f32 %v1525_v11, %v214_v44 }
 0x1b5   :  { %1438 = vmatmul.msk.f32.gmra.mxu1 %vm112_vm1, %v221_v45 }
 0x21a   :  { %v259_v46 = vpop.f32.mrf.mxu1 }
 0x21b   :  { %v1796_v48 = vadd.f32 %v1526_v42, %v259_v46 }
 0x21d   :  { %v1799_v49 = vmul.f32 0.70710677, %v1796_v48 }
 0x21f   :  { %v279_v50 = vmul.f32 %v1799_v49, %v1799_v49 }
 0x221   :  { %v1803_v51 = vmin.f32 %v279_v50, 16.0 }
 0x222   :  { %v262_v47 = vpop.f32.mrf.mxu1 }
 0x223   :  { %v292_v52 = vmul.f32 3.8918573e-05, %v1803_v51  ;;  %v1806_v53 = vadd.f32 %v1526_v42, %v262_v47  ;;  %v281_v21 = vmul.f32 2.1237322e-06, %v1803_v51 }
 0x225   :  { %v293_v54 = vadd.f32 0.001143296, %v292_v52  ;;  %v1809_v55 = vmul.f32 0.70710677, %v1806_v53  ;;  %v282_v32 = vadd.f32 0.00028619796, %v281_v21 }
 0x227   :  { %v294_v56 = vmul.f32 %v293_v54, %v1803_v51  ;;  %v319_v57 = vmul.f32 %v1809_v55, %v1809_v55  ;;  %v283_v45 = vmul.f32 %v282_v32, %v1803_v51 }
 0x229   :  { %v295_v58 = vadd.f32 0.014752088, %v294_v56  ;;  %v320_v59 = vmin.f32 %v319_v57, 16.0 }
 0x22a   :  { %v265_v60 = vpop.f32.mrf.mxu1 }
 0x22b   :  { %v1814_v61 = vadd.f32 %v1526_v42, %v265_v60  ;;  %v321_v62 = vmul.f32 2.1237322e-06, %v320_v59  ;;  %v332_v63 = vmul.f32 3.8918573e-05, %v320_v59  ;;  %v296_v0 = vmul.f32 %v295_v58, %v1803_v51 }
 0x22c   :  { %v284_v58 = vadd.f32 0.0036580483, %v283_v45 }
 0x22d   :  { %v322_v1 = vadd.f32 0.00028619796, %v321_v62  ;;  %v333_v2 = vadd.f32 0.001143296, %v332_v63  ;;  %v1818_v3 = vmul.f32 0.70710677, %v1814_v61 }
 0x22e   :  { %v297_v7 = vadd.f32 0.112945676, %v296_v0 }
 0x22f   :  { %v323_v4 = vmul.f32 %v322_v1, %v320_v59  ;;  %v334_v5 = vmul.f32 %v333_v2, %v320_v59  ;;  %v359_v6 = vmul.f32 %v1818_v3, %v1818_v3 }
 0x230   :  { %v298_v18 = vmul.f32 %v297_v7, %v1803_v51  ;;  %v285_v7 = vmul.f32 %v284_v58, %v1803_v51 }
 0x231   :  { %v324_v8 = vadd.f32 0.0036580483, %v323_v4  ;;  %v335_v9 = vadd.f32 0.014752088, %v334_v5  ;;  %v1822_v10 = vmin.f32 %v359_v6, 16.0 }
 0x232   :  { %v268_v11 = vpop.f32.mrf.mxu1  ;;  %v299_v26 = vadd.f32 0.4994258, %v298_v18 }
 0x233   :  { %v1824_v12 = vadd.f32 %v1526_v42, %v268_v11  ;;  %v336_v13 = vmul.f32 %v335_v9, %v320_v59  ;;  %v361_v14 = vmul.f32 2.1237322e-06, %v1822_v10  ;;  %v325_v15 = vmul.f32 %v324_v8, %v320_v59 }
 0x234   :  { %v372_v16 = vmul.f32 3.8918573e-05, %v1822_v10  ;;  %v300_v39 = vmul.f32 %v299_v26, %v1803_v51 }
 0x235   :  { %v1829_v17 = vmul.f32 0.70710677, %v1824_v12  ;;  %v337_v19 = vadd.f32 0.112945676, %v336_v13  ;;  %v362_v20 = vadd.f32 0.00028619796, %v361_v14 }
 0x236   :  { %v326_v23 = vadd.f32 0.05243302, %v325_v15  ;;  %v373_v24 = vadd.f32 0.001143296, %v372_v16  ;;  %v1846_v52 = vadd.f32 1.0, %v300_v39 }
 0x237   :  { %v338_v22 = vmul.f32 %v337_v19, %v320_v59  ;;  %v399_v25 = vmul.f32 %v1829_v17, %v1829_v17  ;;  %v363_v28 = vmul.f32 %v362_v20, %v1822_v10 }
 0x238   :  { %v374_v30 = vmul.f32 %v373_v24, %v1822_v10  ;;  %v327_v34 = vmul.f32 %v326_v23, %v320_v59  ;;  %vm307_vm7 = vweird.f32 %v1846_v52 }
 0x239   :  { %v339_v27 = vadd.f32 0.4994258, %v338_v22  ;;  %v1837_v31 = vmin.f32 %v399_v25, 16.0  ;;  %v364_v40 = vadd.f32 0.0036580483, %v363_v28 }
 0x23a   :  { %v375_v35 = vadd.f32 0.014752088, %v374_v30  ;;  %v328_v42 = vadd.f32 0.18741608, %v327_v34  ;;  %v286_v22 = vadd.f32 0.05243302, %v285_v7 }
 0x23b   :  { %v340_v33 = vmul.f32 %v339_v27, %v320_v59  ;;  %v401_v36 = vmul.f32 2.1237322e-06, %v1837_v31  ;;  %v412_v38 = vmul.f32 3.8918573e-05, %v1837_v31  ;;  %v365_v54 = vmul.f32 %v364_v40, %v1822_v10 }
 0x23c   :  { %v376_v41 = vmul.f32 %v375_v35, %v1822_v10  ;;  %v329_v60 = vmul.f32 %v328_v42, %v320_v59 }
 0x23d   :  { %v341_v37 = vadd.f32 1.0, %v340_v33  ;;  %v402_v43 = vadd.f32 0.00028619796, %v401_v36  ;;  %v413_v44 = vadd.f32 0.001143296, %v412_v38  ;;  %v287_v36 = vmul.f32 %v286_v22, %v1803_v51 }
 0x23e   :  { %v377_v46 = vadd.f32 0.112945676, %v376_v41  ;;  %v366_v4 = vadd.f32 0.05243302, %v365_v54  ;;  %v330_v8 = vadd.f32 1.1283791, %v329_v60 }
 0x23f   :  { %1547 = vrcp.f32 %v341_v37  ;;  %v403_v50 = vmul.f32 %v402_v43, %v1837_v31  ;;  %v414_v47 = vmul.f32 %v413_v44, %v1837_v31  ;;  %v353_v11 = vand.u32 2147483648, %v341_v37 }
 0x240   :  { %v378_v56 = vmul.f32 %v377_v46, %v1822_v10  ;;  %1549 = vrcp.f32 %v1846_v52  ;;  %v351_v16 = vand.u32 2147483647, %v341_v37  ;;  %v367_v18 = vmul.f32 %v366_v4, %v1822_v10 }
 0x241   :  { %v415_v57 = vadd.f32 0.014752088, %v414_v47  ;;  %v404_v0 = vadd.f32 0.0036580483, %v403_v50  ;;  %vm347_vm0 = vweird.f32 %v341_v37  ;;  %v331_v23 = vmul.f32 %v330_v8, %v1809_v55 }
 0x242   :  { %v379_v62 = vadd.f32 0.4994258, %v378_v56  ;;  %v354_v24 = vor.u32 1.1754944e-38, %v353_v11  ;;  %vm352_vm3 = vcmp.eq.f32.partialorder %v351_v16, 8.507059e+37  ;;  %v368_v27 = vadd.f32 0.18741608, %v367_v18 }
 0x243   :  { %v416_v1 = vmul.f32 %v415_v57, %v1837_v31  ;;  %v405_v59 = vmul.f32 %v404_v0, %v1837_v31  ;;  %v272_v41 = vmul.f32 0.5, %v1806_v53  ;;  %v288_v44 = vadd.f32 0.18741608, %v287_v36 }
 0x244   :  { %v380_v5 = vmul.f32 %v379_v62, %v1822_v10  ;;  %v369_v55 = vmul.f32 %v368_v27, %v1822_v10  ;;  %v273_v18 = vmul.f32 0.5, %v1814_v61 }
 0x245   :  { %v1548_v63 = vpop.eup %1547  ;;  %v417_v6 = vadd.f32 0.112945676, %v416_v1  ;;  %v406_v25 = vadd.f32 0.05243302, %v405_v59  ;;  %v289_v60 = vmul.f32 %v288_v44, %v1803_v51 }
 0x246   :  { %v343_v2 = vmul.f32 %v1548_v63, %v341_v37  ;;  %v381_v13 = vadd.f32 1.0, %v380_v5  ;;  %vm348_vm15 = vweird.f32 %v1548_v63  ;;  %v1857_v19 = vpop.eup %1549  ;;  %v370_v50 = vadd.f32 1.1283791, %v369_v55 }
 0x247   :  { %v418_v14 = vmul.f32 %v417_v6, %v1837_v31  ;;  %vm349_vm2 = vmor %vm347_vm0, %vm348_vm15  ;;  %v303_v30 = vmul.f32 %v1857_v19, %v1846_v52  ;;  %v407_v38 = vmul.f32 %v406_v25, %v1837_v31  ;;  %vm308_vm9 = vweird.f32 %v1857_v19 }
 0x248   :  { %v344_v9 = vsub.f32 1.0, %v343_v2  ;;  %1551 = vrcp.f32 %v381_v13  ;;  %v393_v45 = vand.u32 2147483648, %v381_v13  ;;  %v391_v54 = vand.u32 2147483647, %v381_v13  ;;  %vm1882_vm11 = vmor %vm307_vm7, %vm308_vm9 }
 0x249   :  { %v419_v21 = vadd.f32 0.4994258, %v418_v14  ;;  %v304_v37 = vsub.f32 1.0, %v303_v30  ;;  %v408_v42 = vadd.f32 0.18741608, %v407_v38  ;;  %vm387_vm5 = vweird.f32 %v381_v13 }
 0x24a   :  { %v345_v15 = vmul.f32 %v1548_v63, %v344_v9  ;;  %v394_v53 = vor.u32 1.1754944e-38, %v393_v45  ;;  %v371_v0 = vmul.f32 %v370_v50, %v1818_v3  ;;  %vm392_vm8 = vcmp.eq.f32.partialorder %v391_v54, 8.507059e+37 }
 0x24b   :  { %v420_v28 = vmul.f32 %v419_v21, %v1837_v31  ;;  %v305_v56 = vmul.f32 %v1857_v19, %v304_v37  ;;  %v409_v62 = vmul.f32 %v408_v42, %v1837_v31  ;;  %v311_v5 = vand.u32 2147483647, %v1846_v52 }
 0x24c   :  { %v346_v20 = vadd.f32 %v1548_v63, %v345_v15  ;;  %v313_v31 = vand.u32 2147483648, %v1846_v52  ;;  %v290_v59 = vadd.f32 1.1283791, %v289_v60  ;;  %vm465_vm0 = vcmask 523264  }
 0x24d   :  { %v421_v34 = vadd.f32 1.0, %v420_v28  ;;  %v306_v2 = vadd.f32 %v1857_v19, %v305_v56  ;;  %v410_v8 = vadd.f32 1.1283791, %v409_v62  ;;  %vm312_vm14 = vcmp.eq.f32.partialorder %v311_v5, 8.507059e+37 }
 0x24e   :  { %v350_v26 = vsel %vm349_vm2, %v1548_v63, %v346_v20  ;;  %v1552_v35 = vpop.eup %1551  ;;  %v314_v16 = vor.u32 1.1754944e-38, %v313_v31  ;;  %v274_v28 = vmul.f32 0.5, %v1824_v12 }
 0x24f   :  { %v355_v32 = vsel %vm352_vm3, %v354_v24, %v350_v26  ;;  %v383_v39 = vmul.f32 %v1552_v35, %v381_v13  ;;  %1553 = vrcp.f32 %v421_v34  ;;  %vm388_vm4 = vweird.f32 %v1552_v35 }
 0x250   :  { %v356_v33 = vmul.f32 %v355_v32, %v331_v23  ;;  %vm389_vm6 = vmor %vm387_vm5, %vm388_vm4  ;;  %v433_v7 = vand.u32 2147483648, %v421_v34  ;;  %v431_v11 = vand.u32 2147483647, %v421_v34  ;;  %v310_v14 = vsel %vm1882_vm11, %v1857_v19, %v306_v2 }
 0x251   :  { %v384_v43 = vsub.f32 1.0, %v383_v39  ;;  %vm427_vm12 = vweird.f32 %v421_v34  ;;  %v411_v52 = vmul.f32 %v410_v8, %v1829_v17  ;;  %v315_v23 = vsel %vm312_vm14, %v314_v16, %v310_v14  ;;  %v1527_v14 = vld [vmem:[%s2344_s7] ss:$0 sm:$0xff] }
 0x252   :  { %v1440_v40 = vclamps-f32 %v356_v33, 1.0  ;;  %v434_v20 = vor.u32 1.1754944e-38, %v433_v7  ;;  %vm432_vm15 = vcmp.eq.f32.partialorder %v431_v11, 8.507059e+37  ;;  %v291_v26 = vmul.f32 %v290_v59, %v1799_v49  ;;  %v1528_v59 = vld [vmem:[%s2345_s8] ss:$0 sm:$0xff] }
 0x253   :  { %v385_v47 = vmul.f32 %v1552_v35, %v384_v43 }
 0x254   :  { %v440_v46 = vadd.f32 1.0, %v1440_v40  ;;  %v316_v27 = vmul.f32 %v315_v23, %v291_v26  ;;  %v1617_v40 = vmov 64.0  }
 0x255   :  { %v1554_v10 = vpop.eup %1553  ;;  %v386_v58 = vadd.f32 %v1552_v35, %v385_v47  ;;  %1555 = vrcp.f32 %v1617_v40 }
 0x256   :  { %v1868_v57 = vmul.f32 %v440_v46, %v272_v41  ;;  %v423_v63 = vmul.f32 %v1554_v10, %v421_v34  ;;  %vm428_vm10 = vweird.f32 %v1554_v10  ;;  %v1439_v17 = vclamps-f32 %v316_v27, 1.0 }
 0x257   :  { %v390_v1 = vsel %vm389_vm6, %v1552_v35, %v386_v58  ;;  %vm429_vm13 = vmor %vm427_vm12, %vm428_vm10  ;;  %v271_v34 = vmul.f32 0.5, %v1796_v48 }
 0x258   :  { %455 = vrot.lane.b32.xlu1 %v1868_v57, %s1616_s25  ;;  %v395_v51 = vsel %vm392_vm8, %v394_v53, %v390_v1  ;;  %v424_v4 = vsub.f32 1.0, %v423_v63  ;;  %v439_v33 = vadd.f32 1.0, %v1439_v17 }
 0x259   :  { %v396_v6 = vmul.f32 %v395_v51, %v371_v0 }
 0x25a   :  { %v425_v9 = vmul.f32 %v1554_v10, %v424_v4  ;;  %v1902_v35 = vmul.f32 %v439_v33, %v271_v34 }
 0x25b   :  { %v1441_v13 = vclamps-f32 %v396_v6, 1.0  ;;  %v1556_v41 = vpop.eup %1555 }
 0x25c   :  { %v426_v15 = vadd.f32 %v1554_v10, %v425_v9  ;;  %v479_v43 = vmul.f32 64.0, %v1556_v41  ;;  %vm483_vm2 = vweird.f32 %v1556_v41 }
 0x25d   :  { %v441_v21 = vadd.f32 1.0, %v1441_v13 }
 0x25e   :  { %v430_v22 = vsel %vm429_vm13, %v1554_v10, %v426_v15  ;;  %v480_v44 = vsub.f32 1.0, %v479_v43 }
 0x25f   :  { %v435_v24 = vsel %vm432_vm15, %v434_v20, %v430_v22  ;;  %v1891_v25 = vmul.f32 %v441_v21, %v273_v18 }
 0x260   :  { %v436_v19 = vmul.f32 %v435_v24, %v411_v52  ;;  %v481_v45 = vmul.f32 %v1556_v41, %v480_v44 }
 0x261   :  { %457 = vrot.lane.b32.xlu0 %v1891_v25, %s1616_s25 }
 0x262   :  { %v1442_v61 = vclamps-f32 %v436_v19, 1.0  ;;  %v482_v42 = vadd.f32 %v1556_v41, %v481_v45 }
 0x264   :  { %v442_v30 = vadd.f32 1.0, %v1442_v61  ;;  %v1910_v46 = vsel %vm483_vm2, %v1556_v41, %v482_v42 }
 0x266   :  { %v1897_v32 = vmul.f32 %v442_v30, %v274_v28 }
 0x268   :  { %459 = vrot.lane.b32.xlu2 %v1897_v32, %s1616_s25 }
 0x270   :  { %453 = vrot.lane.b32.xlu2 %v1902_v35, %s1616_s25 }
 0x2c2   :  { %v460_v49 = vpop.permute.xlu2 %459 }
 0x2c3   :  { %v475_v36 = vsel %vm465_vm0, %v460_v49, 0.0 }
 0x2c4   :  { %476 = vadd.xlane.f32.xlu0 %v475_v36 }
 0x2ca   :  { %v456_v12 = vpop.permute.xlu1 %455  ;;  %v454_v55 = vpop.permute.xlu2 %453 }
 0x2cb   :  { %v469_v38 = vsel %vm465_vm0, %v456_v12, 0.0  ;;  %v466_v39 = vsel %vm465_vm0, %v454_v55, 0.0 }
 0x2cc   :  { %470 = vadd.xlane.f32.xlu1 %v469_v38  ;;  %467 = vadd.xlane.f32.xlu0 %v466_v39 }
 0x2d3   :  { %v458_v37 = vpop.permute.xlu0 %457 }
 0x2d4   :  { %v472_v48 = vsel %vm465_vm0, %v458_v37, 0.0 }
 0x2d5   :  { %473 = vadd.xlane.f32.xlu2 %v472_v48 }
 0x337   :  { %v477_v50 = vpop.xlane.xlu0 %476 }
 0x338   :  { %v488_v47 = vmul.f32 %v1910_v46, %v477_v50 }
 0x33a   :  { %v1914_v54 = vsub.f32 %v1897_v32, %v488_v47 }
 0x33c   :  { %v496_v56 = vmul.f32 %v1914_v54, %v1914_v54 }
 0x33e   :  { %507 = vrot.lane.b32.xlu2 %v496_v56, %s1616_s25 }
 0x33f   :  { %v471_v10 = vpop.xlane.xlu1 %470  ;;  %v468_v60 = vpop.xlane.xlu0 %467 }
 0x340   :  { %v486_v58 = vmul.f32 %v1910_v46, %v471_v10  ;;  %v485_v62 = vmul.f32 %v1910_v46, %v468_v60 }
 0x342   :  { %v1921_v53 = vsub.f32 %v1868_v57, %v486_v58  ;;  %v1925_v63 = vsub.f32 %v1902_v35, %v485_v62 }
 0x344   :  { %v494_v0 = vmul.f32 %v1921_v53, %v1921_v53  ;;  %v493_v1 = vmul.f32 %v1925_v63, %v1925_v63 }
 0x346   :  { %503 = vrot.lane.b32.xlu0 %v494_v0, %s1616_s25  ;;  %501 = vrot.lane.b32.xlu2 %v493_v1, %s1616_s25 }
 0x348   :  { %v474_v2 = vpop.xlane.xlu2 %473 }
 0x349   :  { %v487_v51 = vmul.f32 %v1910_v46, %v474_v2 }
 0x34b   :  { %v1935_v4 = vsub.f32 %v1891_v25, %v487_v51 }
 0x34d   :  { %v495_v5 = vmul.f32 %v1935_v4, %v1935_v4 }
 0x34f   :  { %505 = vrot.lane.b32.xlu1 %v495_v5, %s1616_s25 }
 0x398   :  { %v508_v31 = vpop.permute.xlu2 %507 }
 0x399   :  { %v522_v6 = vsel %vm465_vm0, %v508_v31, 0.0 }
 0x39a   :  { %523 = vadd.xlane.f32.xlu0 %v522_v6 }
 0x3a0   :  { %v502_v7 = vpop.permute.xlu2 %501 }
 0x3a1   :  { %v513_v8 = vsel %vm465_vm0, %v502_v7, 0.0 }
 0x3a2   :  { %514 = vadd.xlane.f32.xlu0 %v513_v8 }
 0x3b8   :  { %v504_v9 = vpop.permute.xlu0 %503 }
 0x3b9   :  { %v516_v11 = vsel %vm465_vm0, %v504_v9, 0.0 }
 0x3ba   :  { %517 = vadd.xlane.f32.xlu2 %v516_v11 }
 0x3c1   :  { %v506_v3 = vpop.permute.xlu1 %505 }
 0x3c2   :  { %v519_v13 = vsel %vm465_vm0, %v506_v3, 0.0 }
 0x3c3   :  { %520 = vadd.xlane.f32.xlu1 %v519_v13 }
 0x3d2   :  { %588 = vrot.lane.b32.xlu2 %v1528_v59, %s1616_s25 }
 0x3dc   :  { %579 = vrot.lane.b32.xlu1 %v1527_v14, %s1616_s25 }
 0x40d   :  { %v524_v15 = vpop.xlane.xlu0 %523 }
 0x40e   :  { %v528_v18 = vmul.f32 %v524_v15, %v1910_v46 }
 0x410   :  { %v532_v21 = vadd.f32 1e-05, %v528_v18 }
 0x412   :  { %1557 = vrsqrt.f32 %v532_v21  ;;  %vm569_vm4 = vweird.f32 %v532_v21 }
 0x415   :  { %v515_v16 = vpop.xlane.xlu0 %514 }
 0x416   :  { %v525_v20 = vmul.f32 %v515_v16, %v1910_v46 }
 0x418   :  { %v529_v52 = vadd.f32 1e-05, %v525_v20  ;;  %v1558_v26 = vpop.eup %1557 }
 0x419   :  { %v564_v27 = vmul.f32 %v1558_v26, %v532_v21  ;;  %vm570_vm3 = vweird.f32 %v1558_v26  ;;  %v601_v21 = vld [vmem:[%s2347_s10 + $0x10] sm:$0xff] }
 0x41a   :  { %1559 = vrsqrt.f32 %v529_v52  ;;  %vm1956_vm7 = vmor %vm569_vm4, %vm570_vm3  ;;  %vm539_vm8 = vweird.f32 %v529_v52 }
 0x41b   :  { %v565_v34 = vmul.f32 %v1558_v26, %v564_v27 }
 0x41d   :  { %v566_v38 = vmul.f32 0.5, %v565_v34  ;;  %v596_v34 = vld [vmem:[%s2346_s9 + $0x8] sm:$0xff] }
 0x41f   :  { %v567_v48 = vsub.f32 1.5, %v566_v38  ;;  %v684_v38 = vld [vmem:[%s2348_s11] sm:$0xff] }
 0x420   :  { %v1560_v19 = vpop.eup %1559 }
 0x421   :  { %v534_v28 = vmul.f32 %v1560_v19, %v529_v52  ;;  %v568_v45 = vmul.f32 %v1558_v26, %v567_v48  ;;  %vm540_vm5 = vweird.f32 %v1560_v19  ;;  %v600_v52 = vld [vmem:[%s2347_s10 + $0x8] sm:$0xff] }
 0x422   :  { %vm541_vm9 = vmor %vm539_vm8, %vm540_vm5 }
 0x423   :  { %v535_v36 = vmul.f32 %v1560_v19, %v534_v28  ;;  %v572_v58 = vsel %vm1956_vm7, %v1558_v26, %v568_v45  ;;  %v688_v28 = vld [vmem:[%s2348_s11 + $0x20] sm:$0xff] }
 0x424   :  { %v576_v31 = vmul.f32 %v572_v58, %v1914_v54  ;;  %v599_v54 = vld [vmem:[%s2347_s10] sm:$0xff] }
 0x425   :  { %v536_v55 = vmul.f32 0.5, %v535_v36  ;;  %v598_v36 = vld [vmem:[%s2346_s9 + $0x18] sm:$0xff] }
 0x427   :  { %v537_v40 = vsub.f32 1.5, %v536_v55 }
 0x429   :  { %v538_v42 = vmul.f32 %v1560_v19, %v537_v40 }
 0x42b   :  { %v542_v62 = vsel %vm541_vm9, %v1560_v19, %v538_v42  ;;  %v689_v19 = vld [vmem:[%s2348_s11 + $0x28] sm:$0xff] }
 0x42c   :  { %v573_v51 = vmul.f32 %v542_v62, %v1925_v63  ;;  %v1618_v63 = vmov 0  }
 0x42d   :  { %v518_v22 = vpop.xlane.xlu2 %517  ;;  %1510 = vset.pattern.permute.xlu0 %v1618_v63  ;;  %1512 = vset.pattern.permute.xlu1 %v1618_v63 }
 0x42e   :  { %v526_v23 = vmul.f32 %v518_v22, %v1910_v46  ;;  %1511 = vset.pattern.permute.xlu2 %v1618_v63 }
 0x42f   :  { %610 = vperm.xlu2 %1511, %v600_v52  }
 0x430   :  { %v530_v24 = vadd.f32 1e-05, %v526_v23  ;;  %v691_v23 = vld [vmem:[%s2348_s11 + $0x38] sm:$0xff] }
 0x431   :  { %716 = vmatpush.msra.mxu3 %v691_v23 }
 0x432   :  { %1561 = vrsqrt.f32 %v530_v24  ;;  %vm549_vm10 = vweird.f32 %v530_v24 }
 0x435   :  { %v589_v7 = vpop.permute.xlu2 %588 }
 0x436   :  { %v521_v30 = vpop.xlane.xlu1 %520 }
 0x437   :  { %v527_v33 = vmul.f32 %v521_v30, %v1910_v46  ;;  %v602_v30 = vld [vmem:[%s2347_s10 + $0x18] sm:$0xff] }
 0x438   :  { %v1562_v61 = vpop.eup %1561  ;;  %620 = vperm.xlu2 %1511, %v602_v30  }
 0x439   :  { %v544_v17 = vmul.f32 %v1562_v61, %v530_v24  ;;  %v531_v49 = vadd.f32 1e-05, %v527_v33  ;;  %vm550_vm6 = vweird.f32 %v1562_v61  ;;  %v690_v24 = vld [vmem:[%s2348_s11 + $0x30] sm:$0xff] }
 0x43a   :  { %vm551_vm12 = vmor %vm549_vm10, %vm550_vm6  ;;  %717 = vmatpush.msra.mxu3 %v690_v24  ;;  %v686_v33 = vld [vmem:[%s2348_s11 + $0x10] sm:$0xff] }
 0x43b   :  { %v545_v12 = vmul.f32 %v1562_v61, %v544_v17  ;;  %1563 = vrsqrt.f32 %v531_v49  ;;  %vm559_vm13 = vweird.f32 %v531_v49  ;;  %v687_v17 = vld [vmem:[%s2348_s11 + $0x18] sm:$0xff] }
 0x43c   :  { %718 = vmatpush.msra.mxu3 %v689_v19  ;;  %v1455_v19 = vld [vmem:[%s2342_s5 + $0x30] sm:$0xff] }
 0x43d   :  { %v546_v39 = vmul.f32 0.5, %v545_v12  ;;  %v685_v12 = vld [vmem:[%s2348_s11 + $0x8] sm:$0xff] }
 0x43e   :  { %719 = vmatpush.msra.mxu3 %v688_v28 }
 0x43f   :  { %v547_v41 = vsub.f32 1.5, %v546_v39 }
 0x440   :  { %720 = vmatpush.msra.mxu3 %v687_v17 }
 0x441   :  { %v1564_v37 = vpop.eup %1563  ;;  %v548_v50 = vmul.f32 %v1562_v61, %v547_v41 }
 0x442   :  { %v554_v43 = vmul.f32 %v1564_v37, %v531_v49  ;;  %vm560_vm11 = vweird.f32 %v1564_v37  ;;  %721 = vmatpush.msra.mxu3 %v686_v33  ;;  %v597_v49 = vld [vmem:[%s2346_s9 + $0x10] sm:$0xff] }
 0x443   :  { %v552_v0 = vsel %vm551_vm12, %v1562_v61, %v548_v50  ;;  %vm561_vm14 = vmor %vm559_vm13, %vm560_vm11  ;;  %v595_v61 = vld [vmem:[%s2346_s9] sm:$0xff] }
 0x444   :  { %v555_v44 = vmul.f32 %v1564_v37, %v554_v43  ;;  %v574_v5 = vmul.f32 %v552_v0, %v1921_v53  ;;  %722 = vmatpush.msra.mxu3 %v685_v12 }
 0x446   :  { %v556_v47 = vmul.f32 0.5, %v555_v44  ;;  %723 = vmatpush.msra.mxu3 %v684_v38 }
 0x448   :  { %v557_v10 = vsub.f32 1.5, %v556_v47 }
 0x44a   :  { %v558_v60 = vmul.f32 %v1564_v37, %v557_v10 }
 0x44c   :  { %v562_v1 = vsel %vm561_vm14, %v1564_v37, %v558_v60 }
 0x44d   :  { %v575_v2 = vmul.f32 %v562_v1, %v1935_v4 }
 0x44e   :  { %v580_v6 = vpop.permute.xlu1 %579 }
 0x44f   :  { %v582_v8 = vmul.f32 %v580_v6, %v573_v51  ;;  %v583_v9 = vmul.f32 %v580_v6, %v574_v5  ;;  %v584_v11 = vmul.f32 %v580_v6, %v575_v2  ;;  %v585_v3 = vmul.f32 %v580_v6, %v576_v31 }
 0x451   :  { %v591_v13 = vadd.f32 %v589_v7, %v582_v8  ;;  %v592_v59 = vadd.f32 %v589_v7, %v583_v9  ;;  %v593_v14 = vadd.f32 %v589_v7, %v584_v11  ;;  %v594_v15 = vadd.f32 %v589_v7, %v585_v3 }
 0x453   :  { %v1500_v16 = vpack.i.bf16 %v593_v14, %v594_v15  ;;  %v1505_v18 = vpack.i.bf16 %v591_v13, %v592_v59 }
 0x455   :  { %1501 = vrot.lane.b32.xlu0 %v1500_v16, %s1616_s25  ;;  %1506 = vrot.lane.b32.xlu1 %v1505_v18, %s1616_s25 }
 0x45d   :  { %605 = vperm.xlu0 %1510, %v599_v54   ;;  %615 = vperm.xlu1 %1512, %v601_v21  }
 0x489   :  { %v611_v40 = vpop.permute.xlu2 %610 }
 0x492   :  { %v621_v56 = vpop.permute.xlu2 %620 }
 0x4c7   :  { %v1502_v53 = vpop.permute.xlu0 %1501  ;;  %v1507_v20 = vpop.permute.xlu1 %1506 }
 0x4c8   :  { %v1503_v4 = vunpack.i.l.bf16 %v1502_v53  ;;  %v1504_v22 = vunpack.i.h.bf16 %v1502_v53  ;;  %v1508_v26 = vunpack.i.l.bf16 %v1507_v20  ;;  %v1509_v27 = vunpack.i.h.bf16 %v1507_v20 }
 0x4ca   :  { %663 = vmatpush.msra.mxu2 %v1503_v4 }
 0x4cc   :  { %664 = vmatpush.msra.mxu2 %v1504_v22 }
 0x4ce   :  { %665 = vmatpush.msra.mxu2 %v1508_v26  ;;  %v1456_v26 = vld [vmem:[%s2342_s5 + $0x38] sm:$0xff] }
 0x4cf   :  { %v606_v55 = vpop.permute.xlu0 %605  ;;  %v616_v45 = vpop.permute.xlu1 %615  ;;  %877 = vmatpush.msrb.mxu1 %v1456_v26 }
 0x4d0   :  { %666 = vmatpush.msra.mxu2 %v1509_v27  ;;  %v1454_v27 = vld [vmem:[%s2342_s5 + $0x28] sm:$0xff] }
 0x4d1   :  { %1443 = vmatmul.msk.f32.vlgmr.msra.gmra.mxu2 %vm112_vm1, %v595_v61  ;;  %878 = vmatpush.msrb.mxu1 %v1455_v19  ;;  %v1453_v61 = vld [vmem:[%s2342_s5 + $0x20] sm:$0xff] }
 0x4d3   :  { %879 = vmatpush.msrb.mxu1 %v1454_v27 }
 0x4d5   :  { %880 = vmatpush.msrb.mxu1 %v1453_v61 }
 0x4d9   :  { %1444 = vmatmul.msk.f32.gmra.mxu2 %vm112_vm1, %v596_v34 }
 0x4e1   :  { %1445 = vmatmul.msk.f32.gmra.mxu2 %vm112_vm1, %v597_v49 }
 0x4e9   :  { %1446 = vmatmul.msk.f32.gmra.mxu2 %vm112_vm1, %v598_v36 }
 0x554   :  { %v668_v39 = vpop.f32.mrf.mxu2 }
 0x555   :  { %v669_v37 = vadd.f32 %v668_v39, %v606_v55 }
 0x557   :  { %v680_v48 = vmul.f32 %v669_v37, %v1902_v35 }
 0x559   :  { %1447 = vmatmul.msk.f32.vlgmr.msra.gmra.mxu3 %vm465_vm0, %v680_v48 }
 0x55c   :  { %v671_v41 = vpop.f32.mrf.mxu2 }
 0x55d   :  { %v672_v43 = vadd.f32 %v671_v41, %v611_v40 }
 0x55f   :  { %v681_v44 = vmul.f32 %v672_v43, %v1868_v57  ;;  %v1529_v57 = vld [vmem:[%s2349_s12] ss:$0 sm:$0xff] }
 0x561   :  { %1448 = vmatmul.msk.f32.gmra.mxu3 %vm465_vm0, %v681_v44 }
 0x564   :  { %v674_v42 = vpop.f32.mrf.mxu2 }
 0x565   :  { %v675_v50 = vadd.f32 %v674_v42, %v616_v45  ;;  %v1530_v45 = vld [vmem:[%s2340_s3 + $0x1] ss:$0 sm:$0xff]  ;;  %s1619_s3 = smov [#allocation2]  }
 0x567   :  { %v682_v47 = vmul.f32 %v675_v50, %v1891_v25 }
 0x569   :  { %1449 = vmatmul.msk.f32.gmra.mxu3 %vm465_vm0, %v682_v47 }
 0x56c   :  { %v677_v10 = vpop.f32.mrf.mxu2 }
 0x56d   :  { %v678_v58 = vadd.f32 %v677_v10, %v621_v56  ;;  %v1531_v56 = vld [vmem:[%s2341_s4 + $0x1] ss:$0 sm:$0xff]  ;;  %s1420_s4 = sshll.u32 %s1619_s3, 4  ;;  %s1421_s4 = int_to_ptr.vmem [resolvable:$true] %s1420_s4 }
 0x56f   :  { %v683_v35 = vmul.f32 %v678_v58, %v1897_v32 }
 0x571   :  { %1450 = vmatmul.msk.f32.gmra.mxu3 %vm465_vm0, %v683_v35 }
 0x5dc   :  { %v725_v60 = vpop.f32.mrf.mxu3 }
 0x5dd   :  { %v726_v62 = vadd.f32 %v1529_v57, %v725_v60 }
 0x5df   :  { %v741_v0 = vsel %vm112_vm1, %v726_v62, 0.0 }
 0x5e0   :  { %742 = vadd.xlane.f32.xlu1 %v741_v0 }
 0x5e4   :  { %v728_v1 = vpop.f32.mrf.mxu3 }
 0x5e5   :  { %v729_v25 = vadd.f32 %v1529_v57, %v728_v1 }
 0x5e7   :  { %v744_v2 = vsel %vm112_vm1, %v729_v25, 0.0 }
 0x5e8   :  { %745 = vadd.xlane.f32.xlu0 %v744_v2 }
 0x5ec   :  { %v731_v51 = vpop.f32.mrf.mxu3 }
 0x5ed   :  { %v732_v5 = vadd.f32 %v1529_v57, %v731_v51 }
 0x5ef   :  { %v747_v32 = vsel %vm112_vm1, %v732_v5, 0.0 }
 0x5f0   :  { %748 = vadd.xlane.f32.xlu2 %v747_v32 }
 0x5f4   :  { %v734_v31 = vpop.f32.mrf.mxu3 }
 0x5f5   :  { %v735_v6 = vadd.f32 %v1529_v57, %v734_v31 }
 0x5f7   :  { %v750_v7 = vsel %vm112_vm1, %v735_v6, 0.0 }
 0x5f8   :  { %751 = vadd.xlane.f32.xlu1 %v750_v7 }
 0x653   :  { %v743_v8 = vpop.xlane.xlu1 %742 }
 0x654   :  { %v753_v9 = vmul.f32 %v743_v8, %v1742_v29 }
 0x656   :  { %v757_v11 = vsub.f32 %v726_v62, %v753_v9 }
 0x658   :  { %v761_v3 = vmul.f32 %v757_v11, %v757_v11 }
 0x65a   :  { %v765_v13 = vsel %vm112_vm1, %v761_v3, 0.0 }
 0x65b   :  { %v746_v59 = vpop.xlane.xlu0 %745  ;;  %766 = vadd.xlane.f32.xlu0 %v765_v13 }
 0x65c   :  { %v754_v14 = vmul.f32 %v746_v59, %v1742_v29 }
 0x65e   :  { %v2038_v15 = vsub.f32 %v729_v25, %v754_v14 }
 0x660   :  { %v762_v16 = vmul.f32 %v2038_v15, %v2038_v15 }
 0x662   :  { %v768_v18 = vsel %vm112_vm1, %v762_v16, 0.0 }
 0x663   :  { %v749_v63 = vpop.xlane.xlu2 %748  ;;  %769 = vadd.xlane.f32.xlu2 %v768_v18 }
 0x664   :  { %v755_v54 = vmul.f32 %v749_v63, %v1742_v29 }
 0x666   :  { %v2044_v53 = vsub.f32 %v732_v5, %v755_v54 }
 0x668   :  { %v763_v4 = vmul.f32 %v2044_v53, %v2044_v53 }
 0x66a   :  { %v771_v20 = vsel %vm112_vm1, %v763_v4, 0.0 }
 0x66b   :  { %772 = vadd.xlane.f32.xlu1 %v771_v20  ;;  %v752_v21 = vpop.xlane.xlu1 %751 }
 0x66c   :  { %v756_v52 = vmul.f32 %v752_v21, %v1742_v29 }
 0x66e   :  { %v2050_v22 = vsub.f32 %v735_v6, %v756_v52 }
 0x670   :  { %v764_v23 = vmul.f32 %v2050_v22, %v2050_v22 }
 0x672   :  { %v774_v24 = vsel %vm112_vm1, %v764_v23, 0.0 }
 0x673   :  { %775 = vadd.xlane.f32.xlu0 %v774_v24 }
 0x6ce   :  { %v767_v28 = vpop.xlane.xlu0 %766 }
 0x6cf   :  { %v777_v30 = vmul.f32 %v767_v28, %v1742_v29 }
 0x6d1   :  { %v781_v17 = vadd.f32 1e-05, %v777_v30 }
 0x6d3   :  { %1565 = vrsqrt.f32 %v781_v17  ;;  %vm791_vm2 = vweird.f32 %v781_v17 }
 0x6d6   :  { %v770_v33 = vpop.xlane.xlu2 %769 }
 0x6d7   :  { %v778_v34 = vmul.f32 %v770_v33, %v1742_v29 }
 0x6d9   :  { %v1566_v49 = vpop.eup %1565  ;;  %v782_v36 = vadd.f32 1e-05, %v778_v34 }
 0x6da   :  { %v786_v12 = vmul.f32 %v1566_v49, %v781_v17  ;;  %vm792_vm15 = vweird.f32 %v1566_v49 }
 0x6db   :  { %1567 = vrsqrt.f32 %v782_v36  ;;  %vm793_vm3 = vmor %vm791_vm2, %vm792_vm15  ;;  %vm801_vm5 = vweird.f32 %v782_v36 }
 0x6dc   :  { %v787_v38 = vmul.f32 %v1566_v49, %v786_v12 }
 0x6de   :  { %v788_v55 = vmul.f32 0.5, %v787_v38  ;;  %v773_v39 = vpop.xlane.xlu1 %772 }
 0x6df   :  { %v779_v37 = vmul.f32 %v773_v39, %v1742_v29 }
 0x6e0   :  { %v789_v48 = vsub.f32 1.5, %v788_v55 }
 0x6e1   :  { %v1568_v40 = vpop.eup %1567  ;;  %v783_v41 = vadd.f32 1e-05, %v779_v37 }
 0x6e2   :  { %v790_v43 = vmul.f32 %v1566_v49, %v789_v48  ;;  %v796_v44 = vmul.f32 %v1568_v40, %v782_v36  ;;  %vm802_vm4 = vweird.f32 %v1568_v40 }
 0x6e3   :  { %1569 = vrsqrt.f32 %v783_v41  ;;  %vm803_vm6 = vmor %vm801_vm5, %vm802_vm4  ;;  %vm811_vm8 = vweird.f32 %v783_v41 }
 0x6e4   :  { %v794_v42 = vsel %vm793_vm3, %v1566_v49, %v790_v43  ;;  %v797_v50 = vmul.f32 %v1568_v40, %v796_v44 }
 0x6e5   :  { %v825_v47 = vmul.f32 %v794_v42, %v757_v11 }
 0x6e6   :  { %v798_v10 = vmul.f32 0.5, %v797_v50  ;;  %v776_v58 = vpop.xlane.xlu0 %775 }
 0x6e7   :  { %v780_v35 = vmul.f32 %v776_v58, %v1742_v29  ;;  %v832_v57 = vmul.f32 %v1530_v45, %v825_v47 }
 0x6e8   :  { %v799_v60 = vsub.f32 1.5, %v798_v10 }
 0x6e9   :  { %v1570_v62 = vpop.eup %1569  ;;  %v784_v0 = vadd.f32 1e-05, %v780_v35  ;;  %v839_v1 = vadd.f32 %v1531_v56, %v832_v57 }
 0x6ea   :  { %v800_v25 = vmul.f32 %v1568_v40, %v799_v60  ;;  %v806_v2 = vmul.f32 %v1570_v62, %v783_v41  ;;  %vm812_vm7 = vweird.f32 %v1570_v62 }
 0x6eb   :  { %1571 = vrsqrt.f32 %v784_v0  ;;  %1458 = vmatmul.msk.f32.vlgmr.msrb.gmra.mxu1 %vm112_vm1, %v839_v1  ;;  %vm813_vm9 = vmor %vm811_vm8, %vm812_vm7  ;;  %vm821_vm11 = vweird.f32 %v784_v0 }
 0x6ec   :  { %v804_v51 = vsel %vm803_vm6, %v1568_v40, %v800_v25  ;;  %v807_v5 = vmul.f32 %v1570_v62, %v806_v2 }
 0x6ed   :  { %v826_v32 = vmul.f32 %v804_v51, %v2038_v15 }
 0x6ee   :  { %v808_v31 = vmul.f32 0.5, %v807_v5 }
 0x6ef   :  { %v833_v6 = vmul.f32 %v1530_v45, %v826_v32 }
 0x6f0   :  { %v809_v29 = vsub.f32 1.5, %v808_v31 }
 0x6f1   :  { %v1572_v7 = vpop.eup %1571  ;;  %v840_v8 = vadd.f32 %v1531_v56, %v833_v6 }
 0x6f2   :  { %v810_v9 = vmul.f32 %v1570_v62, %v809_v29  ;;  %v816_v11 = vmul.f32 %v1572_v7, %v784_v0  ;;  %vm822_vm10 = vweird.f32 %v1572_v7 }
 0x6f3   :  { %1459 = vmatmul.msk.f32.gmra.mxu1 %vm112_vm1, %v840_v8  ;;  %vm823_vm12 = vmor %vm821_vm11, %vm822_vm10 }
 0x6f4   :  { %v814_v3 = vsel %vm813_vm9, %v1570_v62, %v810_v9  ;;  %v817_v13 = vmul.f32 %v1572_v7, %v816_v11 }
 0x6f5   :  { %v827_v59 = vmul.f32 %v814_v3, %v2044_v53  ;;  %v1532_v53 = vld [vmem:[%s2343_s6 + $0x1] ss:$0 sm:$0xff] }
 0x6f6   :  { %v818_v14 = vmul.f32 0.5, %v817_v13 }
 0x6f7   :  { %v834_v16 = vmul.f32 %v1530_v45, %v827_v59 }
 0x6f8   :  { %v819_v18 = vsub.f32 1.5, %v818_v14 }
 0x6f9   :  { %v841_v15 = vadd.f32 %v1531_v56, %v834_v16 }
 0x6fa   :  { %v820_v63 = vmul.f32 %v1572_v7, %v819_v18 }
 0x6fb   :  { %1460 = vmatmul.msk.f32.gmra.mxu1 %vm112_vm1, %v841_v15 }
 0x6fc   :  { %v824_v54 = vsel %vm823_vm12, %v1572_v7, %v820_v63 }
 0x6fd   :  { %v828_v4 = vmul.f32 %v824_v54, %v2050_v22 }
 0x6ff   :  { %v835_v20 = vmul.f32 %v1530_v45, %v828_v4 }
 0x701   :  { %v842_v21 = vadd.f32 %v1531_v56, %v835_v20 }
 0x703   :  { %1461 = vmatmul.msk.f32.gmra.mxu1 %vm112_vm1, %v842_v21 }
 0x768   :  { %v882_v52 = vpop.f32.mrf.mxu1 }
 0x769   :  { %v2087_v23 = vadd.f32 %v1532_v53, %v882_v52 }
 0x76b   :  { %v2090_v24 = vmul.f32 0.70710677, %v2087_v23 }
 0x76d   :  { %v902_v26 = vmul.f32 %v2090_v24, %v2090_v24 }
 0x76f   :  { %v2094_v19 = vmin.f32 %v902_v26, 16.0 }
 0x770   :  { %v885_v22 = vpop.f32.mrf.mxu1 }
 0x771   :  { %v915_v27 = vmul.f32 3.8918573e-05, %v2094_v19  ;;  %v2097_v61 = vadd.f32 %v1532_v53, %v885_v22  ;;  %v904_v2 = vmul.f32 2.1237322e-06, %v2094_v19 }
 0x773   :  { %v916_v28 = vadd.f32 0.001143296, %v915_v27  ;;  %v2100_v30 = vmul.f32 0.70710677, %v2097_v61  ;;  %v905_v11 = vadd.f32 0.00028619796, %v904_v2 }
 0x775   :  { %v917_v17 = vmul.f32 %v916_v28, %v2094_v19  ;;  %v942_v33 = vmul.f32 %v2100_v30, %v2100_v30  ;;  %v906_v21 = vmul.f32 %v905_v11, %v2094_v19 }
 0x777   :  { %v918_v34 = vadd.f32 0.014752088, %v917_v17  ;;  %v943_v49 = vmin.f32 %v942_v33, 16.0 }
 0x778   :  { %v888_v36 = vpop.f32.mrf.mxu1 }
 0x779   :  { %v2105_v12 = vadd.f32 %v1532_v53, %v888_v36  ;;  %v944_v38 = vmul.f32 2.1237322e-06, %v943_v49  ;;  %v955_v55 = vmul.f32 3.8918573e-05, %v943_v49  ;;  %v919_v39 = vmul.f32 %v918_v34, %v2094_v19 }
 0x77a   :  { %v907_v34 = vadd.f32 0.0036580483, %v906_v21 }
 0x77b   :  { %v945_v37 = vadd.f32 0.00028619796, %v944_v38  ;;  %v956_v48 = vadd.f32 0.001143296, %v955_v55  ;;  %v2109_v40 = vmul.f32 0.70710677, %v2105_v12 }
 0x77c   :  { %v920_v45 = vadd.f32 0.112945676, %v919_v39 }
 0x77d   :  { %v946_v41 = vmul.f32 %v945_v37, %v943_v49  ;;  %v957_v43 = vmul.f32 %v956_v48, %v943_v49  ;;  %v982_v44 = vmul.f32 %v2109_v40, %v2109_v40 }
 0x77e   :  { %v921_v0 = vmul.f32 %v920_v45, %v2094_v19  ;;  %v908_v45 = vmul.f32 %v907_v34, %v2094_v19 }
 0x77f   :  { %v947_v42 = vadd.f32 0.0036580483, %v946_v41  ;;  %v958_v50 = vadd.f32 0.014752088, %v957_v43  ;;  %v2113_v47 = vmin.f32 %v982_v44, 16.0 }
 0x780   :  { %v891_v56 = vpop.f32.mrf.mxu1  ;;  %v922_v6 = vadd.f32 0.4994258, %v921_v0 }
 0x781   :  { %v2115_v10 = vadd.f32 %v1532_v53, %v891_v56  ;;  %v959_v58 = vmul.f32 %v958_v50, %v943_v49  ;;  %v984_v35 = vmul.f32 2.1237322e-06, %v2113_v47  ;;  %v948_v57 = vmul.f32 %v947_v42, %v943_v49 }
 0x782   :  { %v995_v60 = vmul.f32 3.8918573e-05, %v2113_v47  ;;  %v923_v18 = vmul.f32 %v922_v6, %v2094_v19 }
 0x783   :  { %v2120_v62 = vmul.f32 0.70710677, %v2115_v10  ;;  %v960_v1 = vadd.f32 0.112945676, %v959_v58  ;;  %v985_v25 = vadd.f32 0.00028619796, %v984_v35 }
 0x784   :  { %v949_v5 = vadd.f32 0.05243302, %v948_v57  ;;  %v996_v32 = vadd.f32 0.001143296, %v995_v60  ;;  %v2137_v27 = vadd.f32 1.0, %v923_v18 }
 0x785   :  { %v961_v51 = vmul.f32 %v960_v1, %v943_v49  ;;  %v1022_v31 = vmul.f32 %v2120_v62, %v2120_v62  ;;  %v986_v7 = vmul.f32 %v985_v25, %v2113_v47 }
 0x786   :  { %v997_v8 = vmul.f32 %v996_v32, %v2113_v47  ;;  %v950_v13 = vmul.f32 %v949_v5, %v943_v49  ;;  %vm930_vm6 = vweird.f32 %v2137_v27 }
 0x787   :  { %v962_v29 = vadd.f32 0.4994258, %v961_v51  ;;  %v2128_v9 = vmin.f32 %v1022_v31, 16.0  ;;  %v987_v63 = vadd.f32 0.0036580483, %v986_v7 }
 0x788   :  { %v998_v59 = vadd.f32 0.014752088, %v997_v8  ;;  %v951_v53 = vadd.f32 0.18741608, %v950_v13  ;;  %v909_v51 = vadd.f32 0.05243302, %v908_v45 }
 0x789   :  { %v963_v3 = vmul.f32 %v962_v29, %v943_v49  ;;  %v1024_v14 = vmul.f32 2.1237322e-06, %v2128_v9  ;;  %v1035_v16 = vmul.f32 3.8918573e-05, %v2128_v9  ;;  %v988_v28 = vmul.f32 %v987_v63, %v2113_v47 }
 0x78a   :  { %v999_v54 = vmul.f32 %v998_v59, %v2113_v47  ;;  %v952_v36 = vmul.f32 %v951_v53, %v943_v49 }
 0x78b   :  { %v964_v15 = vadd.f32 1.0, %v963_v3  ;;  %v1025_v4 = vadd.f32 0.00028619796, %v1024_v14  ;;  %v1036_v20 = vadd.f32 0.001143296, %v1035_v16  ;;  %v910_v14 = vmul.f32 %v909_v51, %v2094_v19 }
 0x78c   :  { %v1000_v52 = vadd.f32 0.112945676, %v999_v54  ;;  %v989_v41 = vadd.f32 0.05243302, %v988_v28  ;;  %v953_v42 = vadd.f32 1.1283791, %v952_v36 }
 0x78d   :  { %1573 = vrcp.f32 %v964_v15  ;;  %v1026_v26 = vmul.f32 %v1025_v4, %v2128_v9  ;;  %v1037_v22 = vmul.f32 %v1036_v20, %v2128_v9  ;;  %v976_v56 = vand.u32 2147483648, %v964_v15 }
 0x78e   :  { %v1001_v17 = vmul.f32 %v1000_v52, %v2113_v47  ;;  %1575 = vrcp.f32 %v2137_v27  ;;  %v974_v60 = vand.u32 2147483647, %v964_v15  ;;  %v990_v0 = vmul.f32 %v989_v41, %v2113_v47 }
 0x78f   :  { %v1038_v33 = vadd.f32 0.014752088, %v1037_v22  ;;  %v1027_v39 = vadd.f32 0.0036580483, %v1026_v26  ;;  %vm970_vm14 = vweird.f32 %v964_v15  ;;  %v954_v5 = vmul.f32 %v953_v42, %v2100_v30 }
 0x790   :  { %v1002_v38 = vadd.f32 0.4994258, %v1001_v17  ;;  %v977_v32 = vor.u32 1.1754944e-38, %v976_v56  ;;  %vm975_vm2 = vcmp.eq.f32.partialorder %v974_v60, 8.507059e+37  ;;  %v991_v29 = vadd.f32 0.18741608, %v990_v0 }
 0x791   :  { %v1039_v37 = vmul.f32 %v1038_v33, %v2128_v9  ;;  %v1028_v49 = vmul.f32 %v1027_v39, %v2128_v9  ;;  %v895_v54 = vmul.f32 0.5, %v2097_v61  ;;  %v911_v20 = vadd.f32 0.18741608, %v910_v14 }
 0x792   :  { %v1003_v43 = vmul.f32 %v1002_v38, %v2113_v47  ;;  %v992_v30 = vmul.f32 %v991_v29, %v2113_v47  ;;  %v896_v0 = vmul.f32 0.5, %v2105_v12 }
 0x793   :  { %v1574_v55 = vpop.eup %1573  ;;  %v1040_v44 = vadd.f32 0.112945676, %v1039_v37  ;;  %v1029_v31 = vadd.f32 0.05243302, %v1028_v49  ;;  %v912_v36 = vmul.f32 %v911_v20, %v2094_v19 }
 0x794   :  { %v966_v48 = vmul.f32 %v1574_v55, %v964_v15  ;;  %v1004_v58 = vadd.f32 1.0, %v1003_v43  ;;  %vm971_vm13 = vweird.f32 %v1574_v55  ;;  %v2148_v1 = vpop.eup %1575  ;;  %v993_v26 = vadd.f32 1.1283791, %v992_v30 }
 0x795   :  { %v1041_v35 = vmul.f32 %v1040_v44, %v2128_v9  ;;  %vm972_vm15 = vmor %vm970_vm14, %vm971_vm13  ;;  %v926_v8 = vmul.f32 %v2148_v1, %v2137_v27  ;;  %v1030_v16 = vmul.f32 %v1029_v31, %v2128_v9  ;;  %vm931_vm8 = vweird.f32 %v2148_v1 }
 0x796   :  { %v967_v50 = vsub.f32 1.0, %v966_v48  ;;  %1577 = vrcp.f32 %v1004_v58  ;;  %v1016_v21 = vand.u32 2147483648, %v1004_v58  ;;  %v1014_v28 = vand.u32 2147483647, %v1004_v58  ;;  %vm2173_vm10 = vmor %vm930_vm6, %vm931_vm8 }
 0x797   :  { %v1042_v2 = vadd.f32 0.4994258, %v1041_v35  ;;  %v927_v15 = vsub.f32 1.0, %v926_v8  ;;  %v1031_v53 = vadd.f32 0.18741608, %v1030_v16  ;;  %vm1010_vm4 = vweird.f32 %v1004_v58 }
 0x798   :  { %v968_v57 = vmul.f32 %v1574_v55, %v967_v50  ;;  %v1017_v61 = vor.u32 1.1754944e-38, %v1016_v21  ;;  %v994_v39 = vmul.f32 %v993_v26, %v2109_v40  ;;  %vm1015_vm7 = vcmp.eq.f32.partialorder %v1014_v28, 8.507059e+37 }
 0x799   :  { %v1043_v7 = vmul.f32 %v1042_v2, %v2128_v9  ;;  %v928_v17 = vmul.f32 %v2148_v1, %v927_v15  ;;  %v1032_v38 = vmul.f32 %v1031_v53, %v2128_v9  ;;  %v934_v43 = vand.u32 2147483647, %v2137_v27 }
 0x79a   :  { %v969_v25 = vadd.f32 %v1574_v55, %v968_v57  ;;  %v936_v9 = vand.u32 2147483648, %v2137_v27  ;;  %v913_v49 = vadd.f32 1.1283791, %v912_v36 }
 0x79b   :  { %v1044_v13 = vadd.f32 1.0, %v1043_v7  ;;  %v929_v48 = vadd.f32 %v2148_v1, %v928_v17  ;;  %v1033_v42 = vadd.f32 1.1283791, %v1032_v38  ;;  %vm935_vm13 = vcmp.eq.f32.partialorder %v934_v43, 8.507059e+37  ;;  %v1533_v43 = vld [vmem:[%s2344_s7 + $0x1] ss:$0 sm:$0xff] }
 0x79c   :  { %v973_v6 = vsel %vm972_vm15, %v1574_v55, %v969_v25  ;;  %v1578_v59 = vpop.eup %1577  ;;  %v937_v60 = vor.u32 1.1754944e-38, %v936_v9  ;;  %v897_v7 = vmul.f32 0.5, %v2115_v10 }
 0x79d   :  { %v978_v11 = vsel %vm975_vm2, %v977_v32, %v973_v6  ;;  %v1006_v18 = vmul.f32 %v1578_v59, %v1004_v58  ;;  %1579 = vrcp.f32 %v1044_v13  ;;  %vm1011_vm3 = vweird.f32 %v1578_v59 }
 0x79e   :  { %v979_v3 = vmul.f32 %v978_v11, %v954_v5  ;;  %vm1012_vm5 = vmor %vm1010_vm4, %vm1011_vm3  ;;  %v1056_v45 = vand.u32 2147483648, %v1044_v13  ;;  %v1054_v56 = vand.u32 2147483647, %v1044_v13  ;;  %v933_v35 = vsel %vm2173_vm10, %v2148_v1, %v929_v48 }
 0x79f   :  { %v1007_v4 = vsub.f32 1.0, %v1006_v18  ;;  %vm1050_vm11 = vweird.f32 %v1044_v13  ;;  %v1034_v27 = vmul.f32 %v1033_v42, %v2120_v62  ;;  %v938_v5 = vsel %vm935_vm13, %v937_v60, %v933_v35  ;;  %v1473_v42 = vld [vmem:[%s2347_s10 + $0x28] sm:$0xff] }
 0x7a0   :  { %v1463_v63 = vclamps-f32 %v979_v3, 1.0  ;;  %v1057_v25 = vor.u32 1.1754944e-38, %v1056_v45  ;;  %vm1055_vm14 = vcmp.eq.f32.partialorder %v1054_v56, 8.507059e+37  ;;  %v914_v6 = vmul.f32 %v913_v49, %v2090_v24  ;;  %v1534_v45 = vld [vmem:[%s2345_s8 + $0x1] ss:$0 sm:$0xff] }
 0x7a1   :  { %v1008_v22 = vmul.f32 %v1578_v59, %v1007_v4 }
 0x7a2   :  { %v1063_v52 = vadd.f32 1.0, %v1463_v63  ;;  %v939_v29 = vmul.f32 %v938_v5, %v914_v6 }
 0x7a3   :  { %v1580_v47 = vpop.eup %1579  ;;  %v1009_v34 = vadd.f32 %v1578_v59, %v1008_v22 }
 0x7a4   :  { %v2159_v33 = vmul.f32 %v1063_v52, %v895_v54  ;;  %v1046_v55 = vmul.f32 %v1580_v47, %v1044_v13  ;;  %vm1051_vm9 = vweird.f32 %v1580_v47  ;;  %v1462_v62 = vclamps-f32 %v939_v29, 1.0 }
 0x7a5   :  { %v1013_v37 = vsel %vm1012_vm5, %v1578_v59, %v1009_v34  ;;  %vm1052_vm12 = vmor %vm1050_vm11, %vm1051_vm9  ;;  %v894_v13 = vmul.f32 0.5, %v2087_v23 }
 0x7a6   :  { %1080 = vrot.lane.b32.xlu0 %v2159_v33, %s1616_s25  ;;  %v1018_v41 = vsel %vm1015_vm7, %v1017_v61, %v1013_v37  ;;  %v1047_v19 = vsub.f32 1.0, %v1046_v55  ;;  %v1062_v3 = vadd.f32 1.0, %v1462_v62 }
 0x7a7   :  { %v1019_v44 = vmul.f32 %v1018_v41, %v994_v39 }
 0x7a8   :  { %v1048_v50 = vmul.f32 %v1580_v47, %v1047_v19  ;;  %v2193_v59 = vmul.f32 %v1062_v3, %v894_v13 }
 0x7a9   :  { %v1464_v58 = vclamps-f32 %v1019_v44, 1.0 }
 0x7aa   :  { %v1049_v57 = vadd.f32 %v1580_v47, %v1048_v50 }
 0x7ab   :  { %v1064_v2 = vadd.f32 1.0, %v1464_v58 }
 0x7ac   :  { %v1053_v51 = vsel %vm1052_vm12, %v1580_v47, %v1049_v57 }
 0x7ad   :  { %v1058_v32 = vsel %vm1055_vm14, %v1057_v25, %v1053_v51  ;;  %v2182_v31 = vmul.f32 %v1064_v2, %v896_v0 }
 0x7ae   :  { %v1059_v1 = vmul.f32 %v1058_v32, %v1034_v27 }
 0x7af   :  { %1082 = vrot.lane.b32.xlu1 %v2182_v31, %s1616_s25 }
 0x7b0   :  { %v1465_v12 = vclamps-f32 %v1059_v1, 1.0 }
 0x7b2   :  { %v1065_v8 = vadd.f32 1.0, %v1465_v12 }
 0x7b4   :  { %v2188_v11 = vmul.f32 %v1065_v8, %v897_v7 }
 0x7b6   :  { %1084 = vrot.lane.b32.xlu2 %v2188_v11, %s1616_s25 }
 0x7be   :  { %1078 = vrot.lane.b32.xlu2 %v2193_v59, %s1616_s25 }
 0x810   :  { %v1085_v24 = vpop.permute.xlu2 %1084 }
 0x811   :  { %v1099_v14 = vsel %vm465_vm0, %v1085_v24, 0.0 }
 0x812   :  { %1100 = vadd.xlane.f32.xlu0 %v1099_v14 }
 0x818   :  { %v1081_v10 = vpop.permute.xlu0 %1080  ;;  %v1079_v30 = vpop.permute.xlu2 %1078 }
 0x819   :  { %v1093_v16 = vsel %vm465_vm0, %v1081_v10, 0.0  ;;  %v1090_v18 = vsel %vm465_vm0, %v1079_v30, 0.0 }
 0x81a   :  { %1094 = vadd.xlane.f32.xlu2 %v1093_v16  ;;  %1091 = vadd.xlane.f32.xlu0 %v1090_v18 }
 0x821   :  { %v1083_v15 = vpop.permute.xlu1 %1082 }
 0x822   :  { %v1096_v23 = vsel %vm465_vm0, %v1083_v15, 0.0 }
 0x823   :  { %1097 = vadd.xlane.f32.xlu1 %v1096_v23 }
 0x885   :  { %v1101_v63 = vpop.xlane.xlu0 %1100 }
 0x886   :  { %v1105_v54 = vmul.f32 %v1101_v63, %v1910_v46 }
 0x888   :  { %v2203_v4 = vsub.f32 %v2188_v11, %v1105_v54 }
 0x88a   :  { %v1113_v20 = vmul.f32 %v2203_v4, %v2203_v4 }
 0x88c   :  { %1124 = vrot.lane.b32.xlu1 %v1113_v20, %s1616_s25 }
 0x88d   :  { %v1095_v21 = vpop.xlane.xlu2 %1094  ;;  %v1092_v52 = vpop.xlane.xlu0 %1091 }
 0x88e   :  { %v1103_v53 = vmul.f32 %v1095_v21, %v1910_v46  ;;  %v1102_v22 = vmul.f32 %v1092_v52, %v1910_v46 }
 0x890   :  { %v2210_v26 = vsub.f32 %v2159_v33, %v1103_v53  ;;  %v2217_v17 = vsub.f32 %v2193_v59, %v1102_v22 }
 0x892   :  { %v1111_v28 = vmul.f32 %v2210_v26, %v2210_v26  ;;  %v1110_v36 = vmul.f32 %v2217_v17, %v2217_v17 }
 0x894   :  { %1120 = vrot.lane.b32.xlu0 %v1111_v28, %s1616_s25 }
 0x896   :  { %v1098_v47 = vpop.xlane.xlu1 %1097 }
 0x897   :  { %v1104_v34 = vmul.f32 %v1098_v47, %v1910_v46 }
 0x899   :  { %v2223_v61 = vsub.f32 %v2182_v31, %v1104_v34 }
 0x89b   :  { %v1112_v38 = vmul.f32 %v2223_v61, %v2223_v61 }
 0x89c   :  { %1118 = vrot.lane.b32.xlu0 %v1110_v36, %s1616_s25 }
 0x89d   :  { %1122 = vrot.lane.b32.xlu2 %v1112_v38, %s1616_s25 }
 0x8f7   :  { %v1123_v55 = vpop.permute.xlu2 %1122 }
 0x8f8   :  { %v1136_v39 = vsel %vm465_vm0, %v1123_v55, 0.0 }
 0x8f9   :  { %1137 = vadd.xlane.f32.xlu1 %v1136_v39 }
 0x8fe   :  { %v1125_v9 = vpop.permute.xlu1 %1124 }
 0x8ff   :  { %v1139_v44 = vsel %vm465_vm0, %v1125_v9, 0.0 }
 0x906   :  { %v1121_v37 = vpop.permute.xlu0 %1120 }
 0x907   :  { %v1133_v48 = vsel %vm465_vm0, %v1121_v37, 0.0 }
 0x908   :  { %1134 = vadd.xlane.f32.xlu0 %v1133_v48 }
 0x90e   :  { %v1119_v41 = vpop.permute.xlu0 %1118 }
 0x90f   :  { %v1130_v19 = vsel %vm465_vm0, %v1119_v41, 0.0 }
 0x910   :  { %1131 = vadd.xlane.f32.xlu2 %v1130_v19 }
 0x912   :  { %1196 = vrot.lane.b32.xlu1 %v1533_v43, %s1616_s25 }
 0x918   :  { %1140 = vadd.xlane.f32.xlu2 %v1139_v44  ;;  %v1474_v44 = vld [vmem:[%s2347_s10 + $0x30] sm:$0xff] }
 0x930   :  { %1205 = vrot.lane.b32.xlu2 %v1534_v45, %s1616_s25 }
 0x938   :  { %1229 = vperm.xlu2 %1511, %v1473_v42  }
 0x96c   :  { %v1138_v50 = vpop.xlane.xlu1 %1137 }
 0x96d   :  { %v1144_v56 = vmul.f32 %v1138_v50, %v1910_v46 }
 0x96f   :  { %v1148_v40 = vadd.f32 1e-05, %v1144_v56 }
 0x971   :  { %1581 = vrsqrt.f32 %v1148_v40  ;;  %vm1176_vm8 = vweird.f32 %v1148_v40 }
 0x977   :  { %v1582_v0 = vpop.eup %1581 }
 0x978   :  { %v1171_v51 = vmul.f32 %v1582_v0, %v1148_v40  ;;  %vm1177_vm7 = vweird.f32 %v1582_v0  ;;  %v1487_v40 = vld [vmem:[%s2348_s11 + $0x78] sm:$0xff] }
 0x979   :  { %vm1178_vm9 = vmor %vm1176_vm8, %vm1177_vm7  ;;  %1337 = vmatpush.msrb.mxu0 %v1487_v40 }
 0x97a   :  { %v1172_v29 = vmul.f32 %v1582_v0, %v1171_v51  ;;  %v1470_v51 = vld [vmem:[%s2346_s9 + $0x30] sm:$0xff] }
 0x97b   :  { %v1135_v58 = vpop.xlane.xlu0 %1134 }
 0x97c   :  { %v1143_v49 = vmul.f32 %v1135_v58, %v1910_v46  ;;  %v1173_v13 = vmul.f32 0.5, %v1172_v29  ;;  %v1486_v58 = vld [vmem:[%s2348_s11 + $0x70] sm:$0xff] }
 0x97d   :  { %1338 = vmatpush.msrb.mxu0 %v1486_v58 }
 0x97e   :  { %v1147_v35 = vadd.f32 1e-05, %v1143_v49  ;;  %v1174_v16 = vsub.f32 1.5, %v1173_v13 }
 0x980   :  { %1583 = vrsqrt.f32 %v1147_v35  ;;  %vm1166_vm2 = vweird.f32 %v1147_v35  ;;  %v1175_v63 = vmul.f32 %v1582_v0, %v1174_v16 }
 0x982   :  { %v1179_v47 = vsel %vm1178_vm9, %v1582_v0, %v1175_v63 }
 0x983   :  { %v1132_v57 = vpop.xlane.xlu2 %1131  ;;  %v1192_v39 = vmul.f32 %v1179_v47, %v2223_v61  ;;  %v1472_v61 = vld [vmem:[%s2347_s10 + $0x20] sm:$0xff]  ;;  %v1383_v47 = vld [vmem:[%s2351_s14 + $0x8] sm:$0xff] }
 0x984   :  { %v1142_v60 = vmul.f32 %v1132_v57, %v1910_v46  ;;  %v1197_v20 = vpop.permute.xlu1 %1196 }
 0x985   :  { %v1201_v41 = vmul.f32 %v1197_v20, %v1192_v39 }
 0x986   :  { %v1584_v25 = vpop.eup %1583  ;;  %v1146_v2 = vadd.f32 1e-05, %v1142_v60  ;;  %v1484_v60 = vld [vmem:[%s2348_s11 + $0x60] sm:$0xff] }
 0x987   :  { %v1161_v27 = vmul.f32 %v1584_v25, %v1147_v35  ;;  %vm1167_vm15 = vweird.f32 %v1584_v25  ;;  %v1485_v35 = vld [vmem:[%s2348_s11 + $0x68] sm:$0xff] }
 0x988   :  { %1585 = vrsqrt.f32 %v1146_v2  ;;  %vm1168_vm3 = vmor %vm1166_vm2, %vm1167_vm15  ;;  %vm1156_vm5 = vweird.f32 %v1146_v2  ;;  %1339 = vmatpush.msrb.mxu0 %v1485_v35 }
 0x989   :  { %v1162_v5 = vmul.f32 %v1584_v25, %v1161_v27  ;;  %v1469_v27 = vld [vmem:[%s2346_s9 + $0x28] sm:$0xff] }
 0x98a   :  { %1340 = vmatpush.msrb.mxu0 %v1484_v60 }
 0x98b   :  { %v1163_v32 = vmul.f32 0.5, %v1162_v5  ;;  %v1141_v6 = vpop.xlane.xlu2 %1140  ;;  %v1471_v5 = vld [vmem:[%s2346_s9 + $0x38] sm:$0xff] }
 0x98c   :  { %v1145_v1 = vmul.f32 %v1141_v6, %v1910_v46  ;;  %v1481_v6 = vld [vmem:[%s2348_s11 + $0x48] sm:$0xff] }
 0x98d   :  { %v1164_v12 = vsub.f32 1.5, %v1163_v32  ;;  %v1482_v32 = vld [vmem:[%s2348_s11 + $0x50] sm:$0xff] }
 0x98e   :  { %v1586_v7 = vpop.eup %1585  ;;  %v1149_v8 = vadd.f32 1e-05, %v1145_v1  ;;  %v1480_v1 = vld [vmem:[%s2348_s11 + $0x40] sm:$0xff] }
 0x98f   :  { %v1165_v62 = vmul.f32 %v1584_v25, %v1164_v12  ;;  %v1151_v3 = vmul.f32 %v1586_v7, %v1146_v2  ;;  %vm1157_vm4 = vweird.f32 %v1586_v7  ;;  %v1483_v2 = vld [vmem:[%s2348_s11 + $0x58] sm:$0xff] }
 0x990   :  { %1587 = vrsqrt.f32 %v1149_v8  ;;  %vm1158_vm6 = vmor %vm1156_vm5, %vm1157_vm4  ;;  %vm1186_vm11 = vweird.f32 %v1149_v8  ;;  %1341 = vmatpush.msrb.mxu0 %v1483_v2 }
 0x991   :  { %v1152_v24 = vmul.f32 %v1586_v7, %v1151_v3  ;;  %v1169_v10 = vsel %vm1168_vm3, %v1584_v25, %v1165_v62  ;;  %v1468_v25 = vld [vmem:[%s2346_s9 + $0x20] sm:$0xff] }
 0x992   :  { %v1191_v46 = vmul.f32 %v1169_v10, %v2210_v26  ;;  %1342 = vmatpush.msrb.mxu0 %v1482_v32 }
 0x993   :  { %v1153_v14 = vmul.f32 0.5, %v1152_v24  ;;  %v1206_v26 = vpop.permute.xlu2 %1205 }
 0x994   :  { %v1200_v52 = vmul.f32 %v1197_v20, %v1191_v46  ;;  %v1210_v43 = vadd.f32 %v1206_v26, %v1201_v41  ;;  %1343 = vmatpush.msrb.mxu0 %v1481_v6 }
 0x995   :  { %v1154_v30 = vsub.f32 1.5, %v1153_v14 }
 0x996   :  { %v1588_v18 = vpop.eup %1587  ;;  %v1209_v38 = vadd.f32 %v1206_v26, %v1200_v52  ;;  %1344 = vmatpush.msrb.mxu0 %v1480_v1 }
 0x997   :  { %v1155_v15 = vmul.f32 %v1586_v7, %v1154_v30  ;;  %v1181_v23 = vmul.f32 %v1588_v18, %v1149_v8  ;;  %vm1187_vm10 = vweird.f32 %v1588_v18 }
 0x998   :  { %vm1188_vm12 = vmor %vm1186_vm11, %vm1187_vm10 }
 0x999   :  { %v1159_v54 = vsel %vm1158_vm6, %v1586_v7, %v1155_v15  ;;  %v1182_v21 = vmul.f32 %v1588_v18, %v1181_v23 }
 0x99a   :  { %v1190_v53 = vmul.f32 %v1159_v54, %v2217_v17 }
 0x99b   :  { %v1183_v22 = vmul.f32 0.5, %v1182_v21  ;;  %v1230_v62 = vpop.permute.xlu2 %1229 }
 0x99c   :  { %v1199_v28 = vmul.f32 %v1197_v20, %v1190_v53 }
 0x99d   :  { %v1184_v34 = vsub.f32 1.5, %v1183_v22  ;;  %v1385_v22 = vld [vmem:[%s2351_s14 + $0x18] sm:$0xff] }
 0x99e   :  { %v1208_v36 = vadd.f32 %v1206_v26, %v1199_v28  ;;  %v1384_v28 = vld [vmem:[%s2351_s14 + $0x10] sm:$0xff] }
 0x99f   :  { %v1185_v55 = vmul.f32 %v1588_v18, %v1184_v34  ;;  %v1382_v34 = vld [vmem:[%s2351_s14] sm:$0xff] }
 0x9a0   :  { %v1518_v37 = vpack.i.bf16 %v1208_v36, %v1209_v38  ;;  %v1536_v36 = vld [vmem:[%s2352_s15] ss:$0 sm:$0xff] }
 0x9a1   :  { %v1189_v48 = vsel %vm1188_vm12, %v1588_v18, %v1185_v55 }
 0x9a2   :  { %v1193_v17 = vmul.f32 %v1189_v48, %v2203_v4  ;;  %1519 = vrot.lane.b32.xlu1 %v1518_v37, %s1616_s25  ;;  %v1475_v4 = vld [vmem:[%s2347_s10 + $0x38] sm:$0xff] }
 0x9a4   :  { %v1202_v19 = vmul.f32 %v1197_v20, %v1193_v17 }
 0x9a6   :  { %v1211_v9 = vadd.f32 %v1206_v26, %v1202_v19 }
 0x9a8   :  { %v1513_v45 = vpack.i.bf16 %v1210_v43, %v1211_v9 }
 0x9aa   :  { %1514 = vrot.lane.b32.xlu0 %v1513_v45, %s1616_s25  ;;  %1234 = vperm.xlu1 %1512, %v1474_v44  }
 0x9b2   :  { %1224 = vperm.xlu0 %1510, %v1472_v61  }
 0x9ba   :  { %1239 = vperm.xlu0 %1510, %v1475_v4  }
 0xa14   :  { %v1520_v56 = vpop.permute.xlu1 %1519 }
 0xa15   :  { %v1521_v57 = vunpack.i.l.bf16 %v1520_v56  ;;  %v1522_v0 = vunpack.i.h.bf16 %v1520_v56 }
 0xa1c   :  { %v1515_v42 = vpop.permute.xlu0 %1514  ;;  %v1235_v14 = vpop.permute.xlu1 %1234 }
 0xa1d   :  { %v1516_v50 = vunpack.i.l.bf16 %v1515_v42  ;;  %v1517_v49 = vunpack.i.h.bf16 %v1515_v42 }
 0xa1f   :  { %1282 = vmatpush.msrb.mxu2 %v1516_v50 }
 0xa21   :  { %1283 = vmatpush.msrb.mxu2 %v1517_v49 }
 0xa23   :  { %1284 = vmatpush.msrb.mxu2 %v1521_v57 }
 0xa24   :  { %v1225_v29 = vpop.permute.xlu0 %1224 }
 0xa25   :  { %1285 = vmatpush.msrb.mxu2 %v1522_v0 }
 0xa26   :  { %1476 = vmatmul.msk.f32.vlgmr.msrb.gmra.mxu2 %vm112_vm1, %v1468_v25 }
 0xa2c   :  { %v1240_v18 = vpop.permute.xlu0 %1239 }
 0xa2e   :  { %1477 = vmatmul.msk.f32.gmra.mxu2 %vm112_vm1, %v1469_v27 }
 0xa36   :  { %1478 = vmatmul.msk.f32.gmra.mxu2 %vm112_vm1, %v1470_v51 }
 0xa3e   :  { %1479 = vmatmul.msk.f32.gmra.mxu2 %vm112_vm1, %v1471_v5 }
 0xaa9   :  { %v1287_v12 = vpop.f32.mrf.mxu2 }
 0xaaa   :  { %v1288_v7 = vadd.f32 %v1287_v12, %v1225_v29 }
 0xaac   :  { %v1299_v8 = vmul.f32 %v1288_v7, %v2193_v59 }
 0xaae   :  { %1489 = vmatmul.msk.f32.vlgmr.msrb.gmra.mxu0 %vm465_vm0, %v1299_v8 }
 0xab1   :  { %v1290_v3 = vpop.f32.mrf.mxu2 }
 0xab2   :  { %v1291_v13 = vadd.f32 %v1290_v3, %v1230_v62 }
 0xab4   :  { %v1300_v24 = vmul.f32 %v1291_v13, %v2159_v33  ;;  %v1535_v33 = vld [vmem:[%s2349_s12 + $0x1] ss:$0 sm:$0xff] }
 0xab6   :  { %1490 = vmatmul.msk.f32.gmra.mxu0 %vm465_vm0, %v1300_v24 }
 0xab9   :  { %v1293_v10 = vpop.f32.mrf.mxu2 }
 0xaba   :  { %v1294_v16 = vadd.f32 %v1293_v10, %v1235_v14 }
 0xabc   :  { %v1301_v30 = vmul.f32 %v1294_v16, %v2182_v31 }
 0xabe   :  { %1491 = vmatmul.msk.f32.gmra.mxu0 %vm465_vm0, %v1301_v30 }
 0xac1   :  { %v1296_v46 = vpop.f32.mrf.mxu2 }
 0xac2   :  { %v1297_v15 = vadd.f32 %v1296_v46, %v1240_v18 }
 0xac4   :  { %v1302_v59 = vmul.f32 %v1297_v15, %v2188_v11  ;;  %v1358_v11 = vld [vmem:[%s2350_s13] sm:$0x3] }
 0xac6   :  { %1492 = vmatmul.msk.f32.gmra.mxu0 %vm465_vm0, %v1302_v59  ;;  %vm1413_vm0 = vcmask 123904  }
 0xb2b   :  { %v1346_v23 = vpop.f32.mrf.mxu0 }
 0xb2c   :  { %v1347_v52 = vadd.f32 %v1535_v33, %v1346_v23 }
 0xb33   :  { %v1349_v63 = vpop.f32.mrf.mxu0 }
 0xb34   :  { %v1350_v31 = vadd.f32 %v1535_v33, %v1349_v63 }
 0xb3b   :  { %v1352_v54 = vpop.f32.mrf.mxu0 }
 0xb3c   :  { %v1353_v53 = vadd.f32 %v1535_v33, %v1352_v54 }
 0xb43   :  { %v1355_v20 = vpop.f32.mrf.mxu0 }
 0xb44   :  { %v1356_v21 = vadd.f32 %v1535_v33, %v1355_v20 }
 0xb46   :  { %1374 = vmatpush.msrb.mxu3 %v1356_v21 }
 0xb48   :  { %1375 = vmatpush.msrb.mxu3 %v1353_v53 }
 0xb4a   :  { %1376 = vmatpush.msrb.mxu3 %v1350_v31 }
 0xb4c   :  { %1377 = vmatpush.msrb.mxu3 %v1347_v52 }
 0xb4d   :  { %1493 = vmatmul.msk.f32.vlgmr.msrb.gmra.mxu3 %vm112_vm1, %v1358_v11 }
 0xb4e   :  { %1405 = vmatpush.msra.mxu3 %v1385_v22 }
 0xb50   :  { %1406 = vmatpush.msra.mxu3 %v1384_v28 }
 0xb52   :  { %1407 = vmatpush.msra.mxu3 %v1383_v47 }
 0xb54   :  { %1408 = vmatpush.msra.mxu3 %v1382_v34 }
 0xbd0   :  { %v1379_v26 = vpop.f32.mrf.mxu3 }
 0xbd1   :  { %1494 = vmatmul.msk.f32.vlgmr.msra.gmra.mxu3 %vm112_vm1, %v1379_v26 }
 0xc54   :  { %v1410_v38 = vpop.f32.mrf.mxu3 }
 0xc55   :  { %v1411_v55 = vadd.f32 %v1536_v36, %v1410_v38 }
 0xc57   :  { %1414 = vst.msk [vmem:[#allocation2] sm:$0x3] %vm1413_vm0, %v1411_v55 }
 0xc58   :  { %1425 = dma.vmem_to_hbm [thread:$0]  %s1421_s4, 32, %s1423_s2, [#allocation3]  }
 0xc59   :  { %1613 = dma.done.wait [#allocation3], 32  }
 0xc5a   :  { %1614 = vsyncadd [#allocation3], 4294967264 }
 0xc5b   :  { %1430 = vsyncpa [#allocation3], 1 }

</bundles_post_ra>
